<compile_context>
chip_gen: v7x
topology: tpu7x:2x2x1
jax: 0.10.0
libtpu: 0.0.40
codegen_flags: <defaults>
</compile_context>

<pallas_src>
import functools

import numpy as np

import jax
import jax.numpy as jnp
from jax.experimental import pallas as pl
from jax.experimental.pallas import tpu as pltpu


def _round_up(a, b):
    return (a + b - 1) // b * b


def _choose_point_tile(n, h, c, budget_bytes=24 * 1024 * 1024):
    """Largest power-of-two row tile in {2048..128} whose pipelined footprint
    (double-buffered x tile + bf16 p tile + f32 intermediates) fits a
    conservative budget (keeps us inside v7x's 64 MiB VMEM)."""
    n128 = _round_up(max(n, 1), 128)
    for t in (2048, 1024, 512, 256, 128):
        if t > n128:
            continue
        est = 2 * t * 8 * 4 + 2 * t * c * 2 + t * (h + c) * 4
        if est <= budget_bytes:
            return t
    return 128


# ----------------------------------------------------------------------------
# Pallas kernel: one (cloud b, point-tile t) step of the shared MLP + max-pool.
# Grid = (B, N_pad // TN); batch axis "parallel", point-tile axis "arbitrary".
# ----------------------------------------------------------------------------
def _pointnet_kernel(slot_ref,                      # scalar prefetch (index_maps only)
                     x_ref, w1_ref, w2_ref, b2_ref,
                     p_ref, g_ref,
                     m_ref,                         # (8, C) f32 VMEM scratch
                     *, tn, n_valid, needs_mask):
    del slot_ref
    t = pl.program_id(1)

    # ---- layer 1 (3 -> H) on the MXU: x rows are [x,y,z,1,0,0,0,0], so the
    #      single f32 matmul folds the bias (the ones column hits the b1 row).
    h = jnp.dot(x_ref[...], w1_ref[...], preferred_element_type=jnp.float32)
    h = jnp.maximum(h, 0.0)                                     # (TN, H) f32

    # ---- layer 2 (H -> C) on the MXU: bf16 inputs, f32 accumulation.
    p = jnp.dot(h.astype(jnp.bfloat16), w2_ref[...],
                preferred_element_type=jnp.float32)
    p = jnp.maximum(p + b2_ref[...], 0.0)                       # (TN, C) f32

    p_bf = p.astype(p_ref.dtype)
    p_ref[...] = p_bf                     # bf16 point features (dominant HBM stream)

    # ---- running global max-pool contribution for this tile.
    pm = p_bf.astype(jnp.float32)         # pool over exactly the values emitted
    if needs_mask:
        rows = t * tn + jax.lax.broadcasted_iota(jnp.int32, pm.shape, 0)
        pm = jnp.where(rows < n_valid, pm, -jnp.inf)

    # VPU-only binary tree down to an 8-sublane partial max (no XLU per tile).
    part = pm
    while part.shape[0] > 8:
        half = part.shape[0] // 2
        part = jnp.maximum(part[:half], part[half:])            # (>=8, C)

    @pl.when(t == 0)
    def _():
        m_ref[...] = part

    @pl.when(t > 0)
    def _():
        m_ref[...] = jnp.maximum(m_ref[...], part)

    # One cross-sublane reduce and one (1, C) store per cloud.
    @pl.when(t == pl.num_programs(1) - 1)
    def _():
        g_ref[...] = jnp.max(m_ref[...], axis=0, keepdims=True).astype(g_ref.dtype)


def pointnet_backbone(x, w1, b1, w2, b2, *, out_order=None):
    """Shared per-point MLP backbone (PointNet-style).

    x: [B, N, 3] f32 -> (xyz [B,N,3] f32, p_feat [B,N,C] bf16, g_feat [B,C] f32).
    Cloud b's p_feat / g_feat rows are written to slot out_order[b] (identity by
    default), so FSL episode reordering rides the output DMA for free.
    """
    B, N, k = x.shape
    assert k == 3
    H = w1.shape[1]
    C = w2.shape[1]

    TN = _choose_point_tile(N, H, C)
    n_pad = _round_up(N, TN)
    num_t = n_pad // TN

    if out_order is None:
        out_order = jnp.arange(B, dtype=jnp.int32)
    out_order = out_order.astype(jnp.int32)

    # Pack coords + ones column (folds b1) and zero-pad to K=8 / N=n_pad.
    ones = jnp.ones((B, N, 1), dtype=jnp.float32)
    x_aug = jnp.concatenate([x.astype(jnp.float32), ones], axis=-1)        # (B,N,4)
    x_aug = jnp.pad(x_aug, ((0, 0), (0, n_pad - N), (0, 4)))               # (B,n_pad,8)
    w1_aug = jnp.concatenate(
        [w1.astype(jnp.float32),
         b1.reshape(1, H).astype(jnp.float32),
         jnp.zeros((4, H), jnp.float32)], axis=0)                          # (8,H)
    w2_bf = w2.astype(jnp.bfloat16)                                        # (H,C)
    b2 = b2.reshape(1, C).astype(jnp.float32)

    kernel = functools.partial(_pointnet_kernel, tn=TN, n_valid=N,
                               needs_mask=(n_pad != N))

    flops = 2 * B * n_pad * (8 * H + H * C)
    bytes_accessed = (B * n_pad * 8 * 4      # x_aug read
                      + B * n_pad * C * 2    # p_feat bf16 write
                      + B * C * 4            # g_feat write
                      + 8 * H * 4 + H * C * 2 + C * 4)   # weights (resident)

    grid_spec = pltpu.PrefetchScalarGridSpec(
        num_scalar_prefetch=1,
        grid=(B, num_t),
        in_specs=[
            pl.BlockSpec((None, TN, 8), lambda b, t, slot: (b, t, 0)),   # x tile
            pl.BlockSpec((8, H), lambda b, t, slot: (0, 0)),             # W1 (+b1 row)
            pl.BlockSpec((H, C), lambda b, t, slot: (0, 0)),             # W2 (bf16)
            pl.BlockSpec((1, C), lambda b, t, slot: (0, 0)),             # b2
        ],
        out_specs=[
            # Scatter to episode slot via scalar prefetch.
            pl.BlockSpec((None, TN, C), lambda b, t, slot: (slot[b], t, 0)),
            pl.BlockSpec((None, 1, C), lambda b, t, slot: (slot[b], 0, 0)),
        ],
        scratch_shapes=[pltpu.VMEM((8, C), jnp.float32)],
    )

    # TODO(synk): for v7x with small/odd B, a hierarchical per-tile-max variant
    # (t-axis parallel + tiny final max in XLA) would fill both TensorCores.
    p_feat, g_feat = pl.pallas_call(
        kernel,
        out_shape=(
            jax.ShapeDtypeStruct((B, n_pad, C), jnp.bfloat16),
            jax.ShapeDtypeStruct((B, 1, C), jnp.float32),
        ),
        grid_spec=grid_spec,
        compiler_params=pltpu.CompilerParams(
            dimension_semantics=("parallel", "arbitrary"),
            vmem_limit_bytes=48 * 1024 * 1024,
        ),
        cost_estimate=pl.CostEstimate(
            flops=int(flops), transcendentals=0,
            bytes_accessed=int(bytes_accessed)),
    )(out_order, x_aug, w1_aug, w2_bf, b2)

    if n_pad != N:
        p_feat = p_feat[:, :N, :]
    return x, p_feat, g_feat.reshape(B, C)


# ----------------------------------------------------------------------------
# FSL glue (split_supp_and_query) — pure index arithmetic, stays in JAX.
# Mirrors torch: unique classes (sorted), first `shot` occurrences per class ->
# support, remaining -> query (original order kept within class). Assumes a
# balanced episode (every class appears exactly shot+query times) — the same
# assumption the torch code's stack() makes.
# ----------------------------------------------------------------------------
def validate_balanced_episode(y, *, nway, shot, query):
    """Host-side guard: the output scatter requires a true permutation."""
    y_np = np.asarray(y)
    classes, counts = np.unique(y_np, return_counts=True)
    if len(classes) != nway or not np.all(counts == shot + query):
        raise ValueError(
            f"Unbalanced episode: classes={classes.tolist()} counts={counts.tolist()} "
            f"expected {nway} classes x {shot + query} samples each.")


def episode_permutation(y, *, nway, shot, query):
    order = jnp.argsort(y, stable=True)                  # grouped by class, stable
    per_class = order.reshape(nway, shot + query)
    s_idx = per_class[:, :shot].reshape(-1)
    q_idx = per_class[:, shot:].reshape(-1)
    perm = jnp.concatenate([s_idx, q_idx]).astype(jnp.int32)   # episode pos -> original idx
    inv = jnp.argsort(perm).astype(jnp.int32)                  # original idx -> episode pos
    return perm, inv


@functools.partial(jax.jit, static_argnames=("nway", "shot", "query"))
def fsl_based_model_forward(x, y, params, *, nway, shot, query):
    """FSLBasedModel.feature_embedding + split_supp_and_query."""
    w1, b1, w2, b2 = params
    perm, inv = episode_permutation(y, nway=nway, shot=shot, query=query)
    # Backbone writes p_feat / g_feat directly in episode order (scalar-prefetch
    # scatter), so the big tensors are never re-gathered / concatenated in XLA.
    xyz, p_feat, g_feat = pointnet_backbone(x, w1, b1, w2, b2, out_order=inv)
    z_support = g_feat[: nway * shot]
    z_query = g_feat[nway * shot:]
    y_out = y[perm]
    xyz_out = xyz[perm]
    return y_out, xyz_out, p_feat, z_support, z_query


# TODO(synk): forward() is @abstractmethod in FSLBasedModel (loss/metric head only
# exists in subclasses), and train/val/test loops are host-side driver code —
# only the template's concrete compute is implemented here.


if __name__ == "__main__":
    key = jax.random.PRNGKey(0)

    # Episode layout: nway=2 classes, shot=1 support + query=1 query each.
    NWAY, SHOT, QUERY = 2, 1, 1
    B = NWAY * (SHOT + QUERY)      # 4 point clouds (even -> balanced megacore split)
    N = 640                        # exercises multi-tile (TN=512 -> 2 tiles) + padding/mask path
    H = 128                        # hidden width        (lane-dense)
    C = 128                        # backbone.emb_dims   (lane-dense)

    k_x, k_w1, k_w2 = jax.random.split(key, 3)
    x = jax.random.normal(k_x, (B, N, 3), dtype=jnp.float32)
    y = jnp.array([1, 0, 1, 0], dtype=jnp.int32)   # balanced, non-trivial permutation

    w1 = jax.random.normal(k_w1, (3, H), dtype=jnp.float32) * 0.1
    b1 = jnp.zeros((1, H), dtype=jnp.float32)
    w2 = jax.random.normal(k_w2, (H, C), dtype=jnp.float32) * 0.1
    b2 = jnp.zeros((1, C), dtype=jnp.float32)
    params = (w1, b1, w2, b2)

    validate_balanced_episode(y, nway=NWAY, shot=SHOT, query=QUERY)

    y_out, xyz_out, p_feat, z_support, z_query = fsl_based_model_forward(
        x, y, params, nway=NWAY, shot=SHOT, query=QUERY)
    jax.block_until_ready((y_out, xyz_out, p_feat, z_support, z_query))

    # --- shape contract of the module
    assert xyz_out.shape == (B, N, 3)
    assert p_feat.shape == (B, N, C) and p_feat.dtype == jnp.bfloat16
    assert z_support.shape == (NWAY * SHOT, C)
    assert z_query.shape == (NWAY * QUERY, C)

    # --- numerics: pure-JAX reference using the same recipe
    #     (f32 layer 1 w/ folded bias, bf16 layer 2, bf16 p_feat, max over bf16)
    h_ref = jnp.maximum(
        jnp.einsum("bnk,kh->bnh", x, w1, preferred_element_type=jnp.float32)
        + b1[None], 0.0)
    p_ref32 = jnp.maximum(
        jnp.einsum("bnh,hc->bnc", h_ref.astype(jnp.bfloat16), w2.astype(jnp.bfloat16),
                   preferred_element_type=jnp.float32) + b2[None], 0.0)
    p_ref = p_ref32.astype(jnp.bfloat16)
    g_ref = jnp.max(p_ref.astype(jnp.float32), axis=1)

    perm, _ = episode_permutation(y, nway=NWAY, shot=SHOT, query=QUERY)
    tol = dict(atol=2e-2, rtol=2e-2)
    assert jnp.allclose(p_feat.astype(jnp.float32),
                        p_ref[perm].astype(jnp.float32), **tol)
    assert jnp.allclose(z_support, g_ref[perm[: NWAY * SHOT]], **tol)
    assert jnp.allclose(z_query, g_ref[perm[NWAY * SHOT:]], **tol)
    assert jnp.array_equal(y_out, y[perm])
    assert jnp.allclose(xyz_out, x[perm])

    # standalone feature_embedding (identity output order) also matches
    _, p_chk, g_chk = pointnet_backbone(x, *params)
    assert jnp.allclose(p_chk.astype(jnp.float32), p_ref.astype(jnp.float32), **tol)
    assert jnp.allclose(g_chk, g_ref, **tol)

    print("KERNEL_OK")
</pallas_src>

<mosaic_0001>
module attributes {stable_mosaic.version = 11 : i64} {
  func.func @_pointnet_kernel(%arg0: i32, %arg1: i32, %arg2: memref<4xi32, #tpu.memory_space<smem>>, %arg3: memref<1x512x8xf32, #tpu.memory_space<vmem>>, %arg4: memref<8x128xf32, #tpu.memory_space<vmem>>, %arg5: memref<128x128xbf16, #tpu.memory_space<vmem>>, %arg6: memref<1x128xf32, #tpu.memory_space<vmem>>, %arg7: memref<1x512x128xbf16, #tpu.memory_space<vmem>>, %arg8: memref<1x1x128xf32, #tpu.memory_space<vmem>>, %arg9: memref<8x128xf32, #tpu.memory_space<vmem>>) attributes {dimension_semantics = [#tpu.dimension_semantics<parallel>, #tpu.dimension_semantics<arbitrary>], iteration_bounds = array<i64: 4, 2>, scalar_prefetch = 1 : i64, scratch_operands = 1 : i64, tpu.core_type = #tpu.core_type<tc>, window_params = [{transform_indices = @transform_0, window_bounds = array<i64: 1, 512, 8>}, {pipeline_mode = #tpu.pipeline_mode<synchronous>, transform_indices = @transform_1, window_bounds = array<i64: 8, 128>}, {pipeline_mode = #tpu.pipeline_mode<synchronous>, transform_indices = @transform_2, window_bounds = array<i64: 128, 128>}, {pipeline_mode = #tpu.pipeline_mode<synchronous>, transform_indices = @transform_3, window_bounds = array<i64: 1, 128>}, {transform_indices = @transform_4, window_bounds = array<i64: 1, 512, 128>}, {transform_indices = @transform_5, window_bounds = array<i64: 1, 1, 128>}]} {
    %c0 = arith.constant 0 : index
    %c0_0 = arith.constant 0 : index
    %c0_1 = arith.constant 0 : index
    %0 = vector.load %arg3[%c0, %c0_0, %c0_1] : memref<1x512x8xf32, #tpu.memory_space<vmem>>, vector<1x512x8xf32>
    %1 = vector.shape_cast %0 : vector<1x512x8xf32> to vector<512x8xf32>
    %c0_2 = arith.constant 0 : index
    %c0_3 = arith.constant 0 : index
    %2 = vector.load %arg4[%c0_2, %c0_3] : memref<8x128xf32, #tpu.memory_space<vmem>>, vector<8x128xf32>
    %cst = arith.constant dense<0.000000e+00> : vector<512x128xf32>
    %3 = tpu.matmul %1, %2, %cst {dimension_numbers = #tpu.dot_dimension_numbers<[1], [0], [0], [1], [0, 0, 1, 1], [], []>} : vector<512x8xf32>, vector<8x128xf32>, vector<512x128xf32> -> vector<512x128xf32>
    %cst_4 = arith.constant 0.000000e+00 : f32
    %4 = vector.broadcast %cst_4 : f32 to vector<512x128xf32>
    %5 = arith.maximumf %3, %4 : vector<512x128xf32>
    %6 = arith.truncf %5 : vector<512x128xf32> to vector<512x128xbf16>
    %c0_5 = arith.constant 0 : index
    %c0_6 = arith.constant 0 : index
    %7 = vector.load %arg5[%c0_5, %c0_6] : memref<128x128xbf16, #tpu.memory_space<vmem>>, vector<128x128xbf16>
    %cst_7 = arith.constant dense<0.000000e+00> : vector<512x128xf32>
    %8 = tpu.matmul %6, %7, %cst_7 {dimension_numbers = #tpu.dot_dimension_numbers<[1], [0], [0], [1], [0, 0, 1, 1], [], []>} : vector<512x128xbf16>, vector<128x128xbf16>, vector<512x128xf32> -> vector<512x128xf32>
    %c0_8 = arith.constant 0 : index
    %c0_9 = arith.constant 0 : index
    %9 = vector.load %arg6[%c0_8, %c0_9] : memref<1x128xf32, #tpu.memory_space<vmem>>, vector<1x128xf32>
    %10 = vector.broadcast %9 : vector<1x128xf32> to vector<512x128xf32>
    %11 = arith.addf %8, %10 : vector<512x128xf32>
    %cst_10 = arith.constant 0.000000e+00 : f32
    %12 = vector.broadcast %cst_10 : f32 to vector<512x128xf32>
    %13 = arith.maximumf %11, %12 : vector<512x128xf32>
    %14 = arith.truncf %13 : vector<512x128xf32> to vector<512x128xbf16>
    %c0_11 = arith.constant 0 : index
    %c0_12 = arith.constant 0 : index
    %c0_13 = arith.constant 0 : index
    %15 = vector.load %arg7[%c0_11, %c0_12, %c0_13] : memref<1x512x128xbf16, #tpu.memory_space<vmem>>, vector<1x512x128xbf16>
    %16 = vector.shape_cast %15 : vector<1x512x128xbf16> to vector<512x128xbf16>
    %17 = vector.shape_cast %14 : vector<512x128xbf16> to vector<1x512x128xbf16>
    tpu.vector_store %arg7[%c0_11, %c0_12, %c0_13], %17 {strides = array<i32>} : memref<1x512x128xbf16, #tpu.memory_space<vmem>>, vector<1x512x128xbf16>,
    %18 = arith.extf %14 : vector<512x128xbf16> to vector<512x128xf32>
    %c512_i32 = arith.constant 512 : i32
    %19 = arith.muli %arg1, %c512_i32 : i32
    %20 = tpu.iota {dimensions = array<i32: 0>} : vector<512x128xi32>
    %21 = vector.broadcast %19 : i32 to vector<512x128xi32>
    %22 = arith.addi %21, %20 : vector<512x128xi32>
    %c640_i32 = arith.constant 640 : i32
    %23 = vector.broadcast %c640_i32 : i32 to vector<512x128xi32>
    %24 = arith.cmpi slt, %22, %23 : vector<512x128xi32>
    %cst_14 = arith.constant 0xFF800000 : f32
    %25 = vector.broadcast %cst_14 : f32 to vector<512x128xf32>
    %26 = arith.select %24, %18, %25 : vector<512x128xi1>, vector<512x128xf32>
    %27 = vector.extract_strided_slice %26 {offsets = [0, 0], sizes = [256, 128], strides = [1, 1]} : vector<512x128xf32> to vector<256x128xf32>
    %28 = vector.extract_strided_slice %26 {offsets = [256, 0], sizes = [256, 128], strides = [1, 1]} : vector<512x128xf32> to vector<256x128xf32>
    %29 = arith.maximumf %27, %28 : vector<256x128xf32>
    %30 = vector.extract_strided_slice %29 {offsets = [0, 0], sizes = [128, 128], strides = [1, 1]} : vector<256x128xf32> to vector<128x128xf32>
    %31 = vector.extract_strided_slice %29 {offsets = [128, 0], sizes = [128, 128], strides = [1, 1]} : vector<256x128xf32> to vector<128x128xf32>
    %32 = arith.maximumf %30, %31 : vector<128x128xf32>
    %33 = vector.extract_strided_slice %32 {offsets = [0, 0], sizes = [64, 128], strides = [1, 1]} : vector<128x128xf32> to vector<64x128xf32>
    %34 = vector.extract_strided_slice %32 {offsets = [64, 0], sizes = [64, 128], strides = [1, 1]} : vector<128x128xf32> to vector<64x128xf32>
    %35 = arith.maximumf %33, %34 : vector<64x128xf32>
    %36 = vector.extract_strided_slice %35 {offsets = [0, 0], sizes = [32, 128], strides = [1, 1]} : vector<64x128xf32> to vector<32x128xf32>
    %37 = vector.extract_strided_slice %35 {offsets = [32, 0], sizes = [32, 128], strides = [1, 1]} : vector<64x128xf32> to vector<32x128xf32>
    %38 = arith.maximumf %36, %37 : vector<32x128xf32>
    %39 = vector.extract_strided_slice %38 {offsets = [0, 0], sizes = [16, 128], strides = [1, 1]} : vector<32x128xf32> to vector<16x128xf32>
    %40 = vector.extract_strided_slice %38 {offsets = [16, 0], sizes = [16, 128], strides = [1, 1]} : vector<32x128xf32> to vector<16x128xf32>
    %41 = arith.maximumf %39, %40 : vector<16x128xf32>
    %42 = vector.extract_strided_slice %41 {offsets = [0, 0], sizes = [8, 128], strides = [1, 1]} : vector<16x128xf32> to vector<8x128xf32>
    %43 = vector.extract_strided_slice %41 {offsets = [8, 0], sizes = [8, 128], strides = [1, 1]} : vector<16x128xf32> to vector<8x128xf32>
    %44 = arith.maximumf %42, %43 : vector<8x128xf32>
    %c0_i32 = arith.constant 0 : i32
    %45 = arith.cmpi eq, %arg1, %c0_i32 : i32
    %46 = arith.extui %45 : i1 to i32
    %c0_i32_15 = arith.constant 0 : i32
    %47 = arith.cmpi ne, %46, %c0_i32_15 : i32
    scf.if %47 {
      %c0_19 = arith.constant 0 : index
      %c0_20 = arith.constant 0 : index
      %54 = vector.load %arg9[%c0_19, %c0_20] : memref<8x128xf32, #tpu.memory_space<vmem>>, vector<8x128xf32>
      tpu.vector_store %arg9[%c0_19, %c0_20], %44 {strides = array<i32>} : memref<8x128xf32, #tpu.memory_space<vmem>>, vector<8x128xf32>,
    } else {
    }
    %c0_i32_16 = arith.constant 0 : i32
    %48 = arith.cmpi sgt, %arg1, %c0_i32_16 : i32
    %49 = arith.extui %48 : i1 to i32
    %c0_i32_17 = arith.constant 0 : i32
    %50 = arith.cmpi ne, %49, %c0_i32_17 : i32
    scf.if %50 {
      %c0_19 = arith.constant 0 : index
      %c0_20 = arith.constant 0 : index
      %54 = vector.load %arg9[%c0_19, %c0_20] : memref<8x128xf32, #tpu.memory_space<vmem>>, vector<8x128xf32>
      %55 = arith.maximumf %54, %44 : vector<8x128xf32>
      %c0_21 = arith.constant 0 : index
      %c0_22 = arith.constant 0 : index
      %56 = vector.load %arg9[%c0_21, %c0_22] : memref<8x128xf32, #tpu.memory_space<vmem>>, vector<8x128xf32>
      tpu.vector_store %arg9[%c0_21, %c0_22], %55 {strides = array<i32>} : memref<8x128xf32, #tpu.memory_space<vmem>>, vector<8x128xf32>,
    } else {
    }
    %c1_i32 = arith.constant 1 : i32
    %51 = arith.cmpi eq, %arg1, %c1_i32 : i32
    %52 = arith.extui %51 : i1 to i32
    %c0_i32_18 = arith.constant 0 : i32
    %53 = arith.cmpi ne, %52, %c0_i32_18 : i32
    scf.if %53 {
      %c0_19 = arith.constant 0 : index
      %c0_20 = arith.constant 0 : index
      %54 = vector.load %arg9[%c0_19, %c0_20] : memref<8x128xf32, #tpu.memory_space<vmem>>, vector<8x128xf32>
      %cst_21 = arith.constant dense<0xFF800000> : vector<128xf32>
      %55 = vector.multi_reduction <maximumf>, %54, %cst_21 [0] : vector<8x128xf32> to vector<128xf32>
      %56 = vector.shape_cast %55 : vector<128xf32> to vector<1x128xf32>
      %c0_22 = arith.constant 0 : index
      %c0_23 = arith.constant 0 : index
      %c0_24 = arith.constant 0 : index
      %57 = vector.load %arg8[%c0_22, %c0_23, %c0_24] : memref<1x1x128xf32, #tpu.memory_space<vmem>>, vector<1x1x128xf32>
      %58 = vector.shape_cast %57 : vector<1x1x128xf32> to vector<1x128xf32>
      %59 = vector.shape_cast %56 : vector<1x128xf32> to vector<1x1x128xf32>
      tpu.vector_store %arg8[%c0_22, %c0_23, %c0_24], %59 {strides = array<i32>} : memref<1x1x128xf32, #tpu.memory_space<vmem>>, vector<1x1x128xf32>,
    } else {
    }
    return
  }
  func.func @transform_0(%arg0: i32, %arg1: i32, %arg2: memref<4xi32, #tpu.memory_space<smem>>) -> (i32, i32, i32) {
    %c0_i32 = arith.constant 0 : i32
    %c0_i32_0 = arith.constant 0 : i32
    return %arg0, %arg1, %c0_i32 : i32, i32, i32
  }
  func.func @transform_1(%arg0: i32, %arg1: i32, %arg2: memref<4xi32, #tpu.memory_space<smem>>) -> (i32, i32) {
    %c0_i32 = arith.constant 0 : i32
    %c0_i32_0 = arith.constant 0 : i32
    %c0_i32_1 = arith.constant 0 : i32
    return %c0_i32, %c0_i32_0 : i32, i32
  }
  func.func @transform_2(%arg0: i32, %arg1: i32, %arg2: memref<4xi32, #tpu.memory_space<smem>>) -> (i32, i32) {
    %c0_i32 = arith.constant 0 : i32
    %c0_i32_0 = arith.constant 0 : i32
    %c0_i32_1 = arith.constant 0 : i32
    return %c0_i32, %c0_i32_0 : i32, i32
  }
  func.func @transform_3(%arg0: i32, %arg1: i32, %arg2: memref<4xi32, #tpu.memory_space<smem>>) -> (i32, i32) {
    %c0_i32 = arith.constant 0 : i32
    %c0_i32_0 = arith.constant 0 : i32
    %c0_i32_1 = arith.constant 0 : i32
    return %c0_i32, %c0_i32_0 : i32, i32
  }
  func.func @transform_4(%arg0: i32, %arg1: i32, %arg2: memref<4xi32, #tpu.memory_space<smem>>) -> (i32, i32, i32) {
    %0 = arith.index_cast %arg0 : i32 to index
    %1 = memref.load %arg2[%0] : memref<4xi32, #tpu.memory_space<smem>>
    %c0_i32 = arith.constant 0 : i32
    %c0_i32_0 = arith.constant 0 : i32
    return %1, %arg1, %c0_i32 : i32, i32, i32
  }
  func.func @transform_5(%arg0: i32, %arg1: i32, %arg2: memref<4xi32, #tpu.memory_space<smem>>) -> (i32, i32, i32) {
    %0 = arith.index_cast %arg0 : i32 to index
    %1 = memref.load %arg2[%0] : memref<4xi32, #tpu.memory_space<smem>>
    %c0_i32 = arith.constant 0 : i32
    %c0_i32_0 = arith.constant 0 : i32
    %c0_i32_1 = arith.constant 0 : i32
    return %1, %c0_i32, %c0_i32_0 : i32, i32, i32
  }
}

</mosaic_0001>

<bundles_post_ra>
// kernel: fsl_based_model_forward.1
= control target key start
LH: loop header
LB: loop body
LE: loop exit
PB: predicated region body
PF: predicated region fallthrough
CT: control target
= control target key end

     0   :  { %s3864_s0 = inlined_call_operand.vmem [shape: s32[4], index: 0, kind: input, shape index: {}]   ;;  %s3865_s1 = inlined_call_operand.vmem [shape: f32[4,1024,8], index: 1, kind: input, shape index: {}]   ;;  %s3866_s2 = inlined_call_operand.vmem [shape: f32[8,128], index: 2, kind: input, shape index: {}]   ;;  %s3867_s3 = inlined_call_operand.vmem [shape: bf16[128,128], index: 3, kind: input, shape index: {}]   ;;  %s3868_s4 = inlined_call_operand.vmem [shape: f32[1,128], index: 4, kind: input, shape index: {}]   ;;  %s3869_s5 = inlined_call_operand.vmem [shape: bf16[4,1024,128], index: 5, kind: output, shape index: {0}]   ;;  %s3870_s6 = inlined_call_operand.vmem [shape: f32[4,1,128], index: 6, kind: output, shape index: {1}]  }
   0x1   :  { %s12_s23 = sshll.u32 %s3864_s0, 4  ;;  %s13_s23 = int_to_ptr.vmem [resolvable:$true] %s12_s23 }
   0x2   :  { %s3063_s24 = scalar_lea.vmem %s13_s23, 16  ;;  %p3068_p1 = scmp.lt.s32.totalorder %s13_s23, %s13_s23 }
   0x3   :  { %p3064_p0 = scmp.ne.s32.totalorder %s13_s23, %s3063_s24  ;;  %p3069_p2 = scmp.lt.s32.totalorder %s3063_s24, %s3063_s24 }
   0x5   :  { %p3070_p3 = por %p3069_p2, %p3068_p1 }
   0x7   :  { %p3071_p4 = pnand %p3070_p3, %p3064_p0 }
   0x9   :  { %3074 = shalt.err (!%p3071_p4)  }
   0xa   :  { %s3117_s25 = smov [#allocation4]  }
   0xb   :  { %15 = dma.vmem_to_smem %s13_s23, 16, %s3117_s25, [#allocation3] }
   0xc   :  { %3095 = dma.done.wait [#allocation3], 16 }
   0xd   :  { %3096 = vsyncadd [#allocation3], 4294967280 }
   0xe   :  { %17 = sfence }
   0xf   :  { %s3156_s26 = smov 0   ;;  %s3158_s27 = smov 0  }
  0x10   :  { %s3160_s28 = smov 0   ;;  %s3162_s0 = smov 0  }
  0x11   :  { %s3164_s29 = smov 0  }
  0x12 LB: > { %s32_s30 = sadd.s32 1, %s3107_s28  ;;  %s35_s7 = sadd.s32 1, %s3111_s0  ;;  %s3115_s29 = sphi %s3164_s29, %s23_s29   ;;  %s3111_s0 = sphi %s3162_s0, %s3874_s0   ;;  %s3107_s28 = sphi %s3160_s28, %s3873_s28   ;;  %s3103_s27 = sphi %s3158_s27, %s3872_s27   ;;  %s3099_s26 = sphi %s3156_s26, %s3871_s26  }
  0x13   : > { %p33_p5 = scmp.ge.s32.totalorder %s32_s30, 2  ;;  %p2309_p6 = scmp.ge.s32.totalorder %s3115_s29, 1 }
  0x14   : > { %p222_p7 = scmp.lt.s32.totalorder %s3115_s29, 9 }
  0x15   : > { %s3876_s30 = smov (%p33_p5, %s32_s30), 0  ;;  %s3878_s7 = smov (!%p33_p5, %s35_s7), %s3111_s0 }
  0x16   : > { %p223_p8 = pnand %p2309_p6, %p222_p7  ;;  %p37_p9 = scmp.ge.s32.totalorder %s3878_s7, 4 }
  0x17   : > { %s285_s8 = sld [smem:[#allocation4 + %s3103_s27]] (!%p223_p8)  ;;  %v355_v0 = vld [vmem:[%s3866_s2] sm:$0xff] (!%p223_p8)  ;;  %s2310_s11 = sshll.u32 (!%p223_p8), %s3099_s26, 6  ;;  %vm356_vm0 = vcmask (!%p223_p8), 64512   ;;  %v3055_v2 = vld [vmem:[%s3867_s3 + $0x8] sm:$0xff] (!%p223_p8)   ;;  %v3056_v8 = vld [vmem:[%s3867_s3 + $0x10] sm:$0xff] (!%p223_p8)  }
  0x18   : > { %s3880_s7 = smov (%p37_p9, %s3878_s7), 0  ;;  %226 = sbr.rel (%p223_p8) target bundleno = 642 (0x282), region = 36 }
  0x19   : > { %2819 = vmatprep.subr.mxu0 (!%p223_p8), %v355_v0  ;;  %p264_p10 = scmp.lt.s32.totalorder (!%p223_p8), %s3103_s27, 3  ;;  %p266_p11 = scmp.lt.s32.totalorder (!%p223_p8), %s2310_s11, 127  ;;  %v3054_v1 = vld [vmem:[%s3867_s3] sm:$0xff] (!%p223_p8)   ;;  %v3057_v11 = vld [vmem:[%s3867_s3 + $0x18] sm:$0xff] (!%p223_p8)   ;;  %v3059_v17 = vld [vmem:[%s3867_s3 + $0x28] sm:$0xff] (!%p223_p8)  }
  0x1a   : > { %2820 = vmatpush3.msra.mxu0 (!%p223_p8), %v355_v0  ;;  %2997 = vmatprep.subr.bf16.mxu1 (!%p223_p8), %v3054_v1  ;;  %v3058_v14 = vld [vmem:[%s3867_s3 + $0x20] sm:$0xff] (!%p223_p8)   ;;  %v3060_v52 = vld [vmem:[%s3867_s3 + $0x30] sm:$0xff] (!%p223_p8)   ;;  %v3061_v55 = vld [vmem:[%s3867_s3 + $0x38] sm:$0xff] (!%p223_p8)   ;;  %s2453_s24 = sshll.u32 (!%p223_p8), %s3099_s26, 9  ;;  %p2454_p0 = scmp.ne.s32.totalorder (!%p223_p8), %s3099_s26, 0 }
  0x1b   : > { %2917 = vmatprep.subr.bf16.mxu0 (!%p223_p8), %v3054_v1  ;;  %3005 = vmatpush3.bf16.msra.mxu1 (!%p223_p8), %v3054_v1 }
  0x1c   : > { %2998 = vmatprep.subr.bf16.mxu1 (!%p223_p8), %v3055_v2 }
  0x1d   : > { %p286_p12 = scmp.lt.s32.totalorder (!%p223_p8), %s285_s8, 3 }
  0x1f   : > { %s265_s12 = scalar_select %p264_p10, %s3103_s27, 3  ;;  %3006 = vmatpush3.bf16.msra.mxu1 %v3055_v2 }
  0x20   : > { %s3882_s11 = smov (!%p266_p11, %s2310_s11), 127  ;;  %s3884_s8 = smov (!%p286_p12, %s285_s8), 3  ;;  %2999 = vmatprep.subr.bf16.mxu1 %v3056_v8 }
  0x21   : > { %s2311_s13 = sshll.u32 %s265_s12, 7  ;;  %s288_s25 = scalar_lea.vmem %s3870_s6, %s3884_s8 }
  0x22   : > { %s269_s14 = sadd.s32 %s2311_s13, %s3882_s11 }
  0x23   : > { %s2312_s15 = sshll.u32 %s269_s14, 3  ;;  %3007 = vmatpush3.bf16.msra.mxu1 %v3056_v8 }
  0x24   : > { %s3208_s20 = scalar_lea.vmem %s3865_s1, %s2312_s15  ;;  %3000 = vmatprep.subr.bf16.mxu1 %v3057_v11 }
  0x25   : > { %v291_v3 = vld [vmem:[%s3208_s20] sm:$0xff]  ;;  %v292_v4 = vld [vmem:[%s3208_s20 + $0x8] sm:$0xff]  ;;  %v293_v5 = vld [vmem:[%s3208_s20 + $0x10] sm:$0xff] }
  0x26   : > { %2821 = vmatprep.mubr.msk.f32.mxu0 %vm356_vm0, %v291_v3  ;;  %v294_v6 = vld [vmem:[%s3208_s20 + $0x18] sm:$0xff]  ;;  %v295_v7 = vld [vmem:[%s3208_s20 + $0x20] sm:$0xff]  ;;  %v296_v9 = vld [vmem:[%s3208_s20 + $0x28] sm:$0xff] }
  0x27   : > { %2822 = vmatmul.mubr.msk.f32.vlgmr.msra.gmra.mrb[0].mxu0 %vm356_vm0, %v292_v4  ;;  %v297_v10 = vld [vmem:[%s3208_s20 + $0x30] sm:$0xff]  ;;  %v298_v12 = vld [vmem:[%s3208_s20 + $0x38] sm:$0xff]  ;;  %v299_v13 = vld [vmem:[%s3208_s20 + $0x40] sm:$0xff]  ;;  %3008 = vmatpush3.bf16.msra.mxu1 %v3057_v11 }
  0x28   : > { %2824 = vmatprep.mubr.msk.f32.mxu0 %vm356_vm0, %v293_v5  ;;  %2918 = vmatpush3.bf16.msra.mxu0 %v3054_v1  ;;  %v300_v15 = vld [vmem:[%s3208_s20 + $0x48] sm:$0xff]  ;;  %v301_v16 = vld [vmem:[%s3208_s20 + $0x50] sm:$0xff]  ;;  %v302_v18 = vld [vmem:[%s3208_s20 + $0x58] sm:$0xff] }
  0x29   : > { %2919 = vmatprep.subr.bf16.mxu0 %v3055_v2  ;;  %3001 = vmatprep.subr.bf16.mxu1 %v3058_v14  ;;  %v303_v19 = vld [vmem:[%s3208_s20 + $0x60] sm:$0xff]  ;;  %v304_v20 = vld [vmem:[%s3208_s20 + $0x68] sm:$0xff]  ;;  %v305_v21 = vld [vmem:[%s3208_s20 + $0x70] sm:$0xff] }
  0x2a   : > { %v306_v22 = vld [vmem:[%s3208_s20 + $0x78] sm:$0xff]  ;;  %v307_v23 = vld [vmem:[%s3208_s20 + $0x80] sm:$0xff]  ;;  %v308_v24 = vld [vmem:[%s3208_s20 + $0x88] sm:$0xff] }
  0x2b   : > { %2825 = vmatmul.mubr.msk.f32.gmra.mrb[2].mxu0 %vm356_vm0, %v294_v6  ;;  %3009 = vmatpush3.bf16.msra.mxu1 %v3058_v14  ;;  %v309_v25 = vld [vmem:[%s3208_s20 + $0x90] sm:$0xff]  ;;  %v310_v26 = vld [vmem:[%s3208_s20 + $0x98] sm:$0xff]  ;;  %v311_v27 = vld [vmem:[%s3208_s20 + $0xa0] sm:$0xff] }
  0x2c   : > { %2827 = vmatprep.mubr.msk.f32.mxu0 %vm356_vm0, %v295_v7  ;;  %2920 = vmatpush3.bf16.msra.mxu0 %v3055_v2  ;;  %v312_v28 = vld [vmem:[%s3208_s20 + $0xa8] sm:$0xff]  ;;  %v313_v29 = vld [vmem:[%s3208_s20 + $0xb0] sm:$0xff]  ;;  %v314_v30 = vld [vmem:[%s3208_s20 + $0xb8] sm:$0xff] }
  0x2d   : > { %2921 = vmatprep.subr.bf16.mxu0 %v3056_v8  ;;  %3002 = vmatprep.subr.bf16.mxu1 %v3059_v17  ;;  %v315_v31 = vld [vmem:[%s3208_s20 + $0xc0] sm:$0xff]  ;;  %v316_v32 = vld [vmem:[%s3208_s20 + $0xc8] sm:$0xff]  ;;  %v317_v33 = vld [vmem:[%s3208_s20 + $0xd0] sm:$0xff] }
  0x2e   : > { %v318_v34 = vld [vmem:[%s3208_s20 + $0xd8] sm:$0xff]  ;;  %v319_v35 = vld [vmem:[%s3208_s20 + $0xe0] sm:$0xff]  ;;  %v320_v36 = vld [vmem:[%s3208_s20 + $0xe8] sm:$0xff] }
  0x2f   : > { %2828 = vmatmul.mubr.msk.f32.gmra.mrb[4].mxu0 %vm356_vm0, %v296_v9  ;;  %3010 = vmatpush3.bf16.msra.mxu1 %v3059_v17  ;;  %v321_v37 = vld [vmem:[%s3208_s20 + $0xf0] sm:$0xff]  ;;  %v322_v38 = vld [vmem:[%s3208_s20 + $0xf8] sm:$0xff]  ;;  %v323_v39 = vld [vmem:[%s3208_s20 + $0x100] sm:$0xff] }
  0x30   : > { %2830 = vmatprep.mubr.msk.f32.mxu0 %vm356_vm0, %v297_v10  ;;  %2922 = vmatpush3.bf16.msra.mxu0 %v3056_v8  ;;  %v324_v40 = vld [vmem:[%s3208_s20 + $0x108] sm:$0xff]  ;;  %v325_v41 = vld [vmem:[%s3208_s20 + $0x110] sm:$0xff]  ;;  %v326_v42 = vld [vmem:[%s3208_s20 + $0x118] sm:$0xff] }
  0x31   : > { %2923 = vmatprep.subr.bf16.mxu0 %v3057_v11  ;;  %v327_v43 = vld [vmem:[%s3208_s20 + $0x120] sm:$0xff]  ;;  %v328_v44 = vld [vmem:[%s3208_s20 + $0x128] sm:$0xff]  ;;  %v329_v45 = vld [vmem:[%s3208_s20 + $0x130] sm:$0xff]  ;;  %3003 = vmatprep.subr.bf16.mxu1 %v3060_v52 }
  0x32   : > { %v330_v46 = vld [vmem:[%s3208_s20 + $0x138] sm:$0xff]  ;;  %v331_v47 = vld [vmem:[%s3208_s20 + $0x140] sm:$0xff]  ;;  %v332_v48 = vld [vmem:[%s3208_s20 + $0x148] sm:$0xff] }
  0x33   : > { %2831 = vmatmul.mubr.msk.f32.gmra.mrb[6].mxu0 %vm356_vm0, %v298_v12  ;;  %v333_v49 = vld [vmem:[%s3208_s20 + $0x150] sm:$0xff]  ;;  %v334_v50 = vld [vmem:[%s3208_s20 + $0x158] sm:$0xff]  ;;  %v335_v51 = vld [vmem:[%s3208_s20 + $0x160] sm:$0xff]  ;;  %3011 = vmatpush3.bf16.msra.mxu1 %v3060_v52 }
  0x34   : > { %2833 = vmatprep.mubr.msk.f32.mxu0 %vm356_vm0, %v299_v13  ;;  %2924 = vmatpush3.bf16.msra.mxu0 %v3057_v11  ;;  %v336_v53 = vld [vmem:[%s3208_s20 + $0x168] sm:$0xff]  ;;  %v337_v54 = vld [vmem:[%s3208_s20 + $0x170] sm:$0xff]  ;;  %v338_v56 = vld [vmem:[%s3208_s20 + $0x178] sm:$0xff] }
  0x35   : > { %2925 = vmatprep.subr.bf16.mxu0 %v3058_v14  ;;  %v339_v57 = vld [vmem:[%s3208_s20 + $0x180] sm:$0xff]  ;;  %3004 = vmatprep.subr.bf16.mxu1 %v3061_v55  ;;  %v340_v58 = vld [vmem:[%s3208_s20 + $0x188] sm:$0xff]  ;;  %v341_v59 = vld [vmem:[%s3208_s20 + $0x190] sm:$0xff] }
  0x36   : > { %v342_v60 = vld [vmem:[%s3208_s20 + $0x198] sm:$0xff]  ;;  %v343_v61 = vld [vmem:[%s3208_s20 + $0x1a0] sm:$0xff]  ;;  %v344_v62 = vld [vmem:[%s3208_s20 + $0x1a8] sm:$0xff] }
  0x37   : > { %2834 = vmatmul.mubr.msk.f32.gmra.mrb[8].mxu0 %vm356_vm0, %v300_v15  ;;  %3012 = vmatpush3.bf16.msra.mxu1 %v3061_v55  ;;  %v345_v63 = vld [vmem:[%s3208_s20 + $0x1b0] sm:$0xff]  ;;  %v346_v0 = vld [vmem:[%s3208_s20 + $0x1b8] sm:$0xff]  ;;  %v347_v1 = vld [vmem:[%s3208_s20 + $0x1c0] sm:$0xff] }
  0x38   : > { %2836 = vmatprep.mubr.msk.f32.mxu0 %vm356_vm0, %v301_v16  ;;  %2926 = vmatpush3.bf16.msra.mxu0 %v3058_v14  ;;  %v348_v2 = vld [vmem:[%s3208_s20 + $0x1c8] sm:$0xff]  ;;  %v349_v3 = vld [vmem:[%s3208_s20 + $0x1d0] sm:$0xff]  ;;  %v350_v4 = vld [vmem:[%s3208_s20 + $0x1d8] sm:$0xff] }
  0x39   : > { %2927 = vmatprep.subr.bf16.mxu0 %v3059_v17  ;;  %v351_v5 = vld [vmem:[%s3208_s20 + $0x1e0] sm:$0xff]  ;;  %v352_v6 = vld [vmem:[%s3208_s20 + $0x1e8] sm:$0xff]  ;;  %v353_v7 = vld [vmem:[%s3208_s20 + $0x1f0] sm:$0xff] }
  0x3a   : > { %v354_v8 = vld [vmem:[%s3208_s20 + $0x1f8] sm:$0xff]  ;;  %s273_s20 = sld [smem:[#allocation4 + %s3103_s27]] }
  0x3b   : > { %2837 = vmatmul.mubr.msk.f32.gmra.mrb[10].mxu0 %vm356_vm0, %v302_v18 }
  0x3c   : > { %2839 = vmatprep.mubr.msk.f32.mxu0 %vm356_vm0, %v303_v19  ;;  %2928 = vmatpush3.bf16.msra.mxu0 %v3059_v17 }
  0x3d   : > { %2929 = vmatprep.subr.bf16.mxu0 %v3060_v52 }
  0x3f   : > { %2840 = vmatmul.mubr.msk.f32.gmra.mrb[12].mxu0 %vm356_vm0, %v304_v20 }
  0x40   : > { %2842 = vmatprep.mubr.msk.f32.mxu0 %vm356_vm0, %v305_v21  ;;  %2930 = vmatpush3.bf16.msra.mxu0 %v3060_v52  ;;  %p275_p13 = scmp.lt.s32.totalorder %s273_s20, 3 }
  0x41   : > { %2931 = vmatprep.subr.bf16.mxu0 %v3061_v55 }
  0x42   : > { %s3886_s20 = smov (!%p275_p13, %s273_s20), 3 }
  0x43   : > { %2843 = vmatmul.mubr.msk.f32.gmra.mrb[14].mxu0 %vm356_vm0, %v306_v22  ;;  %s2314_s23 = sshll.u32 %s3886_s20, 7 }
  0x44   : > { %2845 = vmatprep.mubr.msk.f32.mxu0 %vm356_vm0, %v307_v23  ;;  %2932 = vmatpush3.bf16.msra.mxu0 %v3061_v55  ;;  %s280_s12 = sadd.s32 %s2314_s23, %s3882_s11 }
  0x45   : > { %s2315_s27 = sshll.u32 %s280_s12, 2 }
  0x46   : > { %s3395_s14 = scalar_lea.vmem %s3869_s5, %s2315_s27 }
  0x47   : > { %2846 = vmatmul.mubr.msk.f32.gmra.mrb[16].mxu0 %vm356_vm0, %v308_v24 }
  0x48   : > { %2848 = vmatprep.mubr.msk.f32.mxu0 %vm356_vm0, %v309_v25 }
  0x4b   : > { %2849 = vmatmul.mubr.msk.f32.gmra.mrb[18].mxu0 %vm356_vm0, %v310_v26 }
  0x4c   : > { %2851 = vmatprep.mubr.msk.f32.mxu0 %vm356_vm0, %v311_v27 }
  0x4f   : > { %2852 = vmatmul.mubr.msk.f32.gmra.mrb[20].mxu0 %vm356_vm0, %v312_v28 }
  0x50   : > { %2854 = vmatprep.mubr.msk.f32.mxu0 %vm356_vm0, %v313_v29 }
  0x53   : > { %2855 = vmatmul.mubr.msk.f32.gmra.mrb[22].mxu0 %vm356_vm0, %v314_v30 }
  0x54   : > { %2857 = vmatprep.mubr.msk.f32.mxu0 %vm356_vm0, %v315_v31 }
  0x57   : > { %2858 = vmatmul.mubr.msk.f32.gmra.mrb[24].mxu0 %vm356_vm0, %v316_v32 }
  0x58   : > { %2860 = vmatprep.mubr.msk.f32.mxu0 %vm356_vm0, %v317_v33 }
  0x5b   : > { %2861 = vmatmul.mubr.msk.f32.gmra.mrb[26].mxu0 %vm356_vm0, %v318_v34 }
  0x5c   : > { %2863 = vmatprep.mubr.msk.f32.mxu0 %vm356_vm0, %v319_v35 }
  0x5f   : > { %2864 = vmatmul.mubr.msk.f32.gmra.mrb[28].mxu0 %vm356_vm0, %v320_v36 }
  0x60   : > { %2866 = vmatprep.mubr.msk.f32.mxu0 %vm356_vm0, %v321_v37 }
  0x63   : > { %2867 = vmatmul.mubr.msk.f32.gmra.mrb[30].mxu0 %vm356_vm0, %v322_v38 }
  0x64   : > { %2869 = vmatprep.mubr.msk.f32.mxu0 %vm356_vm0, %v323_v39 }
  0x67   : > { %2870 = vmatmul.mubr.msk.f32.gmra.mrb[32].mxu0 %vm356_vm0, %v324_v40 }
  0x68   : > { %2872 = vmatprep.mubr.msk.f32.mxu0 %vm356_vm0, %v325_v41 }
  0x6b   : > { %2873 = vmatmul.mubr.msk.f32.gmra.mrb[34].mxu0 %vm356_vm0, %v326_v42 }
  0x6c   : > { %2875 = vmatprep.mubr.msk.f32.mxu0 %vm356_vm0, %v327_v43 }
  0x6f   : > { %2876 = vmatmul.mubr.msk.f32.gmra.mrb[36].mxu0 %vm356_vm0, %v328_v44 }
  0x70   : > { %2878 = vmatprep.mubr.msk.f32.mxu0 %vm356_vm0, %v329_v45 }
  0x73   : > { %2879 = vmatmul.mubr.msk.f32.gmra.mrb[38].mxu0 %vm356_vm0, %v330_v46 }
  0x74   : > { %2881 = vmatprep.mubr.msk.f32.mxu0 %vm356_vm0, %v331_v47 }
  0x77   : > { %2882 = vmatmul.mubr.msk.f32.gmra.mrb[40].mxu0 %vm356_vm0, %v332_v48 }
  0x78   : > { %2884 = vmatprep.mubr.msk.f32.mxu0 %vm356_vm0, %v333_v49 }
  0x7b   : > { %2885 = vmatmul.mubr.msk.f32.gmra.mrb[42].mxu0 %vm356_vm0, %v334_v50 }
  0x7c   : > { %2887 = vmatprep.mubr.msk.f32.mxu0 %vm356_vm0, %v335_v51 }
  0x7f   : > { %2888 = vmatmul.mubr.msk.f32.gmra.mrb[44].mxu0 %vm356_vm0, %v336_v53 }
  0x80   : > { %2890 = vmatprep.mubr.msk.f32.mxu0 %vm356_vm0, %v337_v54 }
  0x83   : > { %2891 = vmatmul.mubr.msk.f32.gmra.mrb[46].mxu0 %vm356_vm0, %v338_v56 }
  0x84   : > { %2893 = vmatprep.mubr.msk.f32.mxu0 %vm356_vm0, %v339_v57 }
  0x87   : > { %2894 = vmatmul.mubr.msk.f32.gmra.mrb[48].mxu0 %vm356_vm0, %v340_v58 }
  0x88   : > { %2896 = vmatprep.mubr.msk.f32.mxu0 %vm356_vm0, %v341_v59 }
  0x8b   : > { %2897 = vmatmul.mubr.msk.f32.gmra.mrb[50].mxu0 %vm356_vm0, %v342_v60 }
  0x8c   : > { %2899 = vmatprep.mubr.msk.f32.mxu0 %vm356_vm0, %v343_v61 }
  0x8f   : > { %2900 = vmatmul.mubr.msk.f32.gmra.mrb[52].mxu0 %vm356_vm0, %v344_v62 }
  0x90   : > { %2902 = vmatprep.mubr.msk.f32.mxu0 %vm356_vm0, %v345_v63 }
  0x93   : > { %2903 = vmatmul.mubr.msk.f32.gmra.mrb[54].mxu0 %vm356_vm0, %v346_v0 }
  0x94   : > { %2905 = vmatprep.mubr.msk.f32.mxu0 %vm356_vm0, %v347_v1 }
  0x97   : > { %2906 = vmatmul.mubr.msk.f32.gmra.mrb[56].mxu0 %vm356_vm0, %v348_v2 }
  0x98   : > { %2908 = vmatprep.mubr.msk.f32.mxu0 %vm356_vm0, %v349_v3 }
  0x9b   : > { %2909 = vmatmul.mubr.msk.f32.gmra.mrb[58].mxu0 %vm356_vm0, %v350_v4 }
  0x9c   : > { %2911 = vmatprep.mubr.msk.f32.mxu0 %vm356_vm0, %v351_v5 }
  0x9f   : > { %2912 = vmatmul.mubr.msk.f32.gmra.mrb[60].mxu0 %vm356_vm0, %v352_v6 }
  0xa0   : > { %2914 = vmatprep.mubr.msk.f32.mxu0 %vm356_vm0, %v353_v7 }
  0xa3   : > { %2915 = vmatmul.mubr.msk.f32.gmra.mrb[62].mxu0 %vm356_vm0, %v354_v8 }
  0xfa   : > { %v2823_v9 = vpop.f32.mrb[0].mxu0 }
  0xfb   : > { %v935_v10 = vmax.f32 %v2823_v9, 0.0  ;;  %v615_v11 = vpop.f32.mrb[1].mxu0 }
  0xfc   : > { %v934_v12 = vmax.f32 %v615_v11, 0.0 }
  0xfe   : > { %v998_v13 = vpack.c.bf16 %v935_v10, %v934_v12  ;;  %v2826_v14 = vpop.f32.mrb[2].mxu0 }
  0xff   : > { %v937_v15 = vmax.f32 %v2826_v14, 0.0  ;;  %v625_v16 = vpop.f32.mrb[3].mxu0 }
 0x100   : > { %v936_v17 = vmax.f32 %v625_v16, 0.0  ;;  %2933 = vmatprep.mubr.bf16.mxu0 %v998_v13 }
 0x102   : > { %v999_v18 = vpack.c.bf16 %v937_v15, %v936_v17  ;;  %v2829_v19 = vpop.f32.mrb[4].mxu0 }
 0x103   : > { %v939_v20 = vmax.f32 %v2829_v19, 0.0  ;;  %v635_v21 = vpop.f32.mrb[5].mxu0 }
 0x104   : > { %v938_v22 = vmax.f32 %v635_v21, 0.0  ;;  %2934 = vmatmul.mubr.bf16.vlgmr.msra.gmra.mrb[64].mxu0 %v999_v18 }
 0x106   : > { %v2832_v23 = vpop.f32.mrb[6].mxu0  ;;  %v1000_v24 = vpack.c.bf16 %v939_v20, %v938_v22 }
 0x107   : > { %v941_v25 = vmax.f32 %v2832_v23, 0.0  ;;  %v645_v26 = vpop.f32.mrb[7].mxu0 }
 0x108   : > { %v940_v27 = vmax.f32 %v645_v26, 0.0  ;;  %2937 = vmatprep.mubr.bf16.mxu1 %v1000_v24 }
 0x10a   : > { %v1001_v28 = vpack.c.bf16 %v941_v25, %v940_v27  ;;  %v2835_v29 = vpop.f32.mrb[8].mxu0 }
 0x10b   : > { %v943_v30 = vmax.f32 %v2835_v29, 0.0  ;;  %v655_v31 = vpop.f32.mrb[9].mxu0 }
 0x10c   : > { %v942_v32 = vmax.f32 %v655_v31, 0.0  ;;  %2938 = vmatmul.mubr.bf16.vlgmr.msra.gmra.mrb[0].mxu1 %v1001_v28 }
 0x10e   : > { %v1002_v33 = vpack.c.bf16 %v943_v30, %v942_v32  ;;  %v2838_v34 = vpop.f32.mrb[10].mxu0 }
 0x10f   : > { %v945_v35 = vmax.f32 %v2838_v34, 0.0  ;;  %v665_v36 = vpop.f32.mrb[11].mxu0 }
 0x110   : > { %v944_v37 = vmax.f32 %v665_v36, 0.0  ;;  %2941 = vmatprep.mubr.bf16.mxu1 %v1002_v33 }
 0x112   : > { %v1003_v38 = vpack.c.bf16 %v945_v35, %v944_v37  ;;  %v2841_v39 = vpop.f32.mrb[12].mxu0 }
 0x113   : > { %v947_v40 = vmax.f32 %v2841_v39, 0.0  ;;  %v675_v41 = vpop.f32.mrb[13].mxu0 }
 0x114   : > { %v946_v42 = vmax.f32 %v675_v41, 0.0  ;;  %2942 = vmatmul.mubr.bf16.gmra.mrb[4].mxu1 %v1003_v38 }
 0x116   : > { %v1004_v43 = vpack.c.bf16 %v947_v40, %v946_v42  ;;  %v2844_v44 = vpop.f32.mrb[14].mxu0 }
 0x117   : > { %v949_v45 = vmax.f32 %v2844_v44, 0.0  ;;  %v685_v46 = vpop.f32.mrb[15].mxu0 }
 0x118   : > { %v948_v47 = vmax.f32 %v685_v46, 0.0  ;;  %2945 = vmatprep.mubr.bf16.mxu1 %v1004_v43 }
 0x11a   : > { %v1005_v48 = vpack.c.bf16 %v949_v45, %v948_v47  ;;  %v2847_v49 = vpop.f32.mrb[16].mxu0 }
 0x11b   : > { %v951_v50 = vmax.f32 %v2847_v49, 0.0  ;;  %v695_v51 = vpop.f32.mrb[17].mxu0 }
 0x11c   : > { %v950_v52 = vmax.f32 %v695_v51, 0.0  ;;  %2946 = vmatmul.mubr.bf16.gmra.mrb[8].mxu1 %v1005_v48 }
 0x11e   : > { %v1006_v53 = vpack.c.bf16 %v951_v50, %v950_v52  ;;  %v2850_v54 = vpop.f32.mrb[18].mxu0 }
 0x11f   : > { %v953_v55 = vmax.f32 %v2850_v54, 0.0  ;;  %v705_v56 = vpop.f32.mrb[19].mxu0 }
 0x120   : > { %v952_v57 = vmax.f32 %v705_v56, 0.0  ;;  %2949 = vmatprep.mubr.bf16.mxu1 %v1006_v53 }
 0x122   : > { %v1007_v58 = vpack.c.bf16 %v953_v55, %v952_v57  ;;  %v2853_v59 = vpop.f32.mrb[20].mxu0 }
 0x123   : > { %v955_v60 = vmax.f32 %v2853_v59, 0.0  ;;  %v715_v61 = vpop.f32.mrb[21].mxu0 }
 0x124   : > { %v954_v62 = vmax.f32 %v715_v61, 0.0  ;;  %2950 = vmatmul.mubr.bf16.gmra.mrb[12].mxu1 %v1007_v58 }
 0x126   : > { %v1008_v63 = vpack.c.bf16 %v955_v60, %v954_v62  ;;  %v2856_v0 = vpop.f32.mrb[22].mxu0 }
 0x127   : > { %v957_v1 = vmax.f32 %v2856_v0, 0.0  ;;  %v725_v2 = vpop.f32.mrb[23].mxu0 }
 0x128   : > { %v956_v3 = vmax.f32 %v725_v2, 0.0  ;;  %2953 = vmatprep.mubr.bf16.mxu1 %v1008_v63 }
 0x12a   : > { %v1009_v4 = vpack.c.bf16 %v957_v1, %v956_v3  ;;  %v2859_v5 = vpop.f32.mrb[24].mxu0 }
 0x12b   : > { %v959_v6 = vmax.f32 %v2859_v5, 0.0  ;;  %v735_v7 = vpop.f32.mrb[25].mxu0 }
 0x12c   : > { %v958_v8 = vmax.f32 %v735_v7, 0.0  ;;  %2954 = vmatmul.mubr.bf16.gmra.mrb[16].mxu1 %v1009_v4 }
 0x12e   : > { %v1010_v9 = vpack.c.bf16 %v959_v6, %v958_v8  ;;  %v2862_v10 = vpop.f32.mrb[26].mxu0 }
 0x12f   : > { %v961_v11 = vmax.f32 %v2862_v10, 0.0  ;;  %v745_v12 = vpop.f32.mrb[27].mxu0 }
 0x130   : > { %v960_v13 = vmax.f32 %v745_v12, 0.0  ;;  %2957 = vmatprep.mubr.bf16.mxu1 %v1010_v9 }
 0x132   : > { %v1011_v14 = vpack.c.bf16 %v961_v11, %v960_v13  ;;  %v2865_v15 = vpop.f32.mrb[28].mxu0 }
 0x133   : > { %v963_v16 = vmax.f32 %v2865_v15, 0.0  ;;  %v755_v17 = vpop.f32.mrb[29].mxu0 }
 0x134   : > { %v962_v18 = vmax.f32 %v755_v17, 0.0  ;;  %2958 = vmatmul.mubr.bf16.gmra.mrb[20].mxu1 %v1011_v14 }
 0x136   : > { %v1012_v19 = vpack.c.bf16 %v963_v16, %v962_v18  ;;  %v2868_v20 = vpop.f32.mrb[30].mxu0 }
 0x137   : > { %v965_v21 = vmax.f32 %v2868_v20, 0.0  ;;  %v765_v22 = vpop.f32.mrb[31].mxu0 }
 0x138   : > { %v964_v23 = vmax.f32 %v765_v22, 0.0  ;;  %2961 = vmatprep.mubr.bf16.mxu1 %v1012_v19 }
 0x13a   : > { %v1013_v24 = vpack.c.bf16 %v965_v21, %v964_v23  ;;  %v2871_v25 = vpop.f32.mrb[32].mxu0 }
 0x13b   : > { %v967_v26 = vmax.f32 %v2871_v25, 0.0  ;;  %v775_v27 = vpop.f32.mrb[33].mxu0 }
 0x13c   : > { %v966_v28 = vmax.f32 %v775_v27, 0.0  ;;  %2962 = vmatmul.mubr.bf16.gmra.mrb[24].mxu1 %v1013_v24 }
 0x13e   : > { %v1014_v29 = vpack.c.bf16 %v967_v26, %v966_v28  ;;  %v2874_v30 = vpop.f32.mrb[34].mxu0 }
 0x13f   : > { %v969_v31 = vmax.f32 %v2874_v30, 0.0  ;;  %v785_v32 = vpop.f32.mrb[35].mxu0 }
 0x140   : > { %v968_v33 = vmax.f32 %v785_v32, 0.0  ;;  %2965 = vmatprep.mubr.bf16.mxu1 %v1014_v29 }
 0x142   : > { %v1015_v34 = vpack.c.bf16 %v969_v31, %v968_v33  ;;  %v2877_v35 = vpop.f32.mrb[36].mxu0 }
 0x143   : > { %v971_v36 = vmax.f32 %v2877_v35, 0.0  ;;  %v795_v37 = vpop.f32.mrb[37].mxu0 }
 0x144   : > { %v970_v38 = vmax.f32 %v795_v37, 0.0  ;;  %2966 = vmatmul.mubr.bf16.gmra.mrb[28].mxu1 %v1015_v34 }
 0x146   : > { %v1016_v39 = vpack.c.bf16 %v971_v36, %v970_v38  ;;  %v2880_v40 = vpop.f32.mrb[38].mxu0 }
 0x147   : > { %v973_v41 = vmax.f32 %v2880_v40, 0.0  ;;  %v805_v42 = vpop.f32.mrb[39].mxu0 }
 0x148   : > { %v972_v43 = vmax.f32 %v805_v42, 0.0  ;;  %2969 = vmatprep.mubr.bf16.mxu1 %v1016_v39 }
 0x14a   : > { %v1017_v44 = vpack.c.bf16 %v973_v41, %v972_v43  ;;  %v2883_v45 = vpop.f32.mrb[40].mxu0  ;;  %v1839_v41 = vlaneseq  ;;  %v3370_v43 = vld [vmem:[%s3868_s4] ss:$0 sm:$0xff] }
 0x14b   : > { %v975_v46 = vmax.f32 %v2883_v45, 0.0  ;;  %v815_v47 = vpop.f32.mrb[41].mxu0 }
 0x14c   : > { %v974_v48 = vmax.f32 %v815_v47, 0.0  ;;  %2970 = vmatmul.mubr.bf16.gmra.mrb[32].mxu1 %v1017_v44  ;;  %v3364_v42 = vshrl.u32 %v1839_v41, 7  ;;  %v3375_v47 = vstv %s2453_s24 }
 0x14e   : > { %v1018_v49 = vpack.c.bf16 %v975_v46, %v974_v48  ;;  %v2886_v50 = vpop.f32.mrb[42].mxu0  ;;  %v1842_v44 = vadd.s32 16, %v3364_v42  ;;  %v1843_v45 = vadd.s32 24, %v3364_v42  ;;  %v1841_v48 = vadd.s32 8, %v3364_v42 }
 0x14f   : > { %v977_v51 = vmax.f32 %v2886_v50, 0.0  ;;  %v825_v52 = vpop.f32.mrb[43].mxu0  ;;  %v1854_v41 = vadd.s32 112, %v3364_v42 }
 0x150   : > { %v976_v53 = vmax.f32 %v825_v52, 0.0  ;;  %2973 = vmatprep.mubr.bf16.mxu1 %v1018_v49 }
 0x152   : > { %v1019_v54 = vpack.c.bf16 %v977_v51, %v976_v53  ;;  %v2889_v55 = vpop.f32.mrb[44].mxu0  ;;  %v1846_v51 = vadd.s32 48, %v3364_v42 }
 0x153   : > { %v979_v56 = vmax.f32 %v2889_v55, 0.0  ;;  %v835_v57 = vpop.f32.mrb[45].mxu0 }
 0x154   : > { %v978_v58 = vmax.f32 %v835_v57, 0.0  ;;  %2974 = vmatmul.mubr.bf16.gmra.mrb[36].mxu1 %v1019_v54  ;;  %v1847_v54 = vadd.s32 56, %v3364_v42  ;;  %v1908_v57 = vadd.s32 %v3375_v47, %v1843_v45 }
 0x156   : > { %v1020_v59 = vpack.c.bf16 %v979_v56, %v978_v58  ;;  %v2892_v60 = vpop.f32.mrb[46].mxu0  ;;  %v1907_v56 = vadd.s32 %v3375_v47, %v1842_v44  ;;  %vm1972_vm2 = vcmp.lt.s32.totalorder %v1908_v57, 640 }
 0x157   : > { %v981_v61 = vmax.f32 %v2892_v60, 0.0  ;;  %v845_v62 = vpop.f32.mrb[47].mxu0 }
 0x158   : > { %v980_v63 = vmax.f32 %v845_v62, 0.0  ;;  %2977 = vmatprep.mubr.bf16.mxu1 %v1020_v59  ;;  %v1905_v59 = vadd.s32 %v3375_v47, %v3364_v42  ;;  %vm1971_vm1 = vcmp.lt.s32.totalorder %v1907_v56, 640 }
 0x15a   : > { %v1021_v0 = vpack.c.bf16 %v981_v61, %v980_v63  ;;  %v2895_v1 = vpop.f32.mrb[48].mxu0  ;;  %v1906_v61 = vadd.s32 %v3375_v47, %v1841_v48  ;;  %vm1969_vm3 = vcmp.lt.s32.totalorder %v1905_v59, 640 }
 0x15b   : > { %v983_v2 = vmax.f32 %v2895_v1, 0.0  ;;  %v855_v3 = vpop.f32.mrb[49].mxu0 }
 0x15c   : > { %v982_v4 = vmax.f32 %v855_v3, 0.0  ;;  %2978 = vmatmul.mubr.bf16.gmra.mrb[40].mxu1 %v1021_v0  ;;  %v3390_v0 = vadd.s32 %v3375_v47, %v1846_v51  ;;  %v3398_v3 = vadd.s32 %v3375_v47, %v1847_v54  ;;  %vm1970_vm4 = vcmp.lt.s32.totalorder %v1906_v61, 640 }
 0x15d   : > { %v3445_v61 = vadd.s32 %v3375_v47, %v1854_v41 }
 0x15e   : > { %v1022_v5 = vpack.c.bf16 %v983_v2, %v982_v4  ;;  %v2898_v6 = vpop.f32.mrb[50].mxu0  ;;  %vm1975_vm5 = vcmp.lt.s32.totalorder %v3390_v0, 640  ;;  %vm1976_vm6 = vcmp.lt.s32.totalorder %v3398_v3, 640 }
 0x15f   : > { %v985_v7 = vmax.f32 %v2898_v6, 0.0  ;;  %v865_v8 = vpop.f32.mrb[51].mxu0  ;;  %vm1983_vm13 = vcmp.lt.s32.totalorder %v3445_v61, 640 }
 0x160   : > { %v984_v9 = vmax.f32 %v865_v8, 0.0  ;;  %2981 = vmatprep.mubr.bf16.mxu1 %v1022_v5  ;;  %v1845_v8 = vadd.s32 40, %v3364_v42 }
 0x162   : > { %v1023_v10 = vpack.c.bf16 %v985_v7, %v984_v9  ;;  %v2901_v11 = vpop.f32.mrb[52].mxu0  ;;  %v1844_v7 = vadd.s32 32, %v3364_v42 }
 0x163   : > { %v987_v12 = vmax.f32 %v2901_v11, 0.0  ;;  %v875_v13 = vpop.f32.mrb[53].mxu0 }
 0x164   : > { %v986_v14 = vmax.f32 %v875_v13, 0.0  ;;  %2982 = vmatmul.mubr.bf16.gmra.mrb[44].mxu1 %v1023_v10 }
 0x166   : > { %v1024_v15 = vpack.c.bf16 %v987_v12, %v986_v14  ;;  %v2904_v16 = vpop.f32.mrb[54].mxu0 }
 0x167   : > { %v989_v17 = vmax.f32 %v2904_v16, 0.0  ;;  %v885_v18 = vpop.f32.mrb[55].mxu0  ;;  %v1850_v16 = vadd.s32 80, %v3364_v42 }
 0x168   : > { %v988_v19 = vmax.f32 %v885_v18, 0.0  ;;  %2985 = vmatprep.mubr.bf16.mxu1 %v1024_v15 }
 0x16a   : > { %v1025_v20 = vpack.c.bf16 %v989_v17, %v988_v19  ;;  %v2907_v21 = vpop.f32.mrb[56].mxu0  ;;  %v1851_v17 = vadd.s32 88, %v3364_v42 }
 0x16b   : > { %v991_v22 = vmax.f32 %v2907_v21, 0.0  ;;  %v895_v23 = vpop.f32.mrb[57].mxu0 }
 0x16c   : > { %v990_v24 = vmax.f32 %v895_v23, 0.0  ;;  %2986 = vmatmul.mubr.bf16.gmra.mrb[48].mxu1 %v1025_v20 }
 0x16e   : > { %v1026_v25 = vpack.c.bf16 %v991_v22, %v990_v24  ;;  %v2910_v26 = vpop.f32.mrb[58].mxu0 }
 0x16f   : > { %v993_v27 = vmax.f32 %v2910_v26, 0.0  ;;  %v905_v28 = vpop.f32.mrb[59].mxu0  ;;  %v1910_v26 = vadd.s32 %v3375_v47, %v1845_v8 }
 0x170   : > { %v992_v29 = vmax.f32 %v905_v28, 0.0  ;;  %2989 = vmatprep.mubr.bf16.mxu1 %v1026_v25  ;;  %v1909_v25 = vadd.s32 %v3375_v47, %v1844_v7 }
 0x171   : > { %vm1974_vm8 = vcmp.lt.s32.totalorder %v1910_v26, 640  ;;  %v1859_v26 = vadd.s32 152, %v3364_v42 }
 0x172   : > { %v1027_v30 = vpack.c.bf16 %v993_v27, %v992_v29  ;;  %v2913_v31 = vpop.f32.mrb[60].mxu0  ;;  %vm1973_vm7 = vcmp.lt.s32.totalorder %v1909_v25, 640 }
 0x173   : > { %v995_v32 = vmax.f32 %v2913_v31, 0.0  ;;  %v915_v33 = vpop.f32.mrb[61].mxu0 }
 0x174   : > { %v994_v34 = vmax.f32 %v915_v33, 0.0  ;;  %2990 = vmatmul.mubr.bf16.gmra.mrb[52].mxu1 %v1027_v30  ;;  %v1848_v30 = vadd.s32 64, %v3364_v42  ;;  %v3422_v33 = vadd.s32 %v3375_v47, %v1851_v17 }
 0x176   : > { %v1028_v35 = vpack.c.bf16 %v995_v32, %v994_v34  ;;  %v2916_v36 = vpop.f32.mrb[62].mxu0  ;;  %v3419_v32 = vadd.s32 %v3375_v47, %v1850_v16  ;;  %v1849_v34 = vadd.s32 72, %v3364_v42  ;;  %vm1980_vm10 = vcmp.lt.s32.totalorder %v3422_v33, 640 }
 0x177   : > { %v997_v37 = vmax.f32 %v2916_v36, 0.0  ;;  %v925_v38 = vpop.f32.mrb[63].mxu0 }
 0x178   : > { %v996_v39 = vmax.f32 %v925_v38, 0.0  ;;  %2993 = vmatprep.mubr.bf16.mxu1 %v1028_v35  ;;  %vm1979_vm9 = vcmp.lt.s32.totalorder %v3419_v32, 640 }
 0x17a   : > { %v1029_v40 = vpack.c.bf16 %v997_v37, %v996_v39 }
 0x17c   : > { %2994 = vmatmul.mubr.bf16.gmra.mrb[56].mxu1 %v1029_v40 }
 0x1d7   : > { %v2935_v46 = vpop.f32.mrb[64].mxu0 }
 0x1d8   : > { %v1144_v49 = vadd.f32 %v2935_v46, %v3370_v43  ;;  %v1135_v50 = vpop.f32.mrb[65].mxu0 }
 0x1d9   : > { %v1136_v52 = vadd.f32 %v3370_v43, %v1135_v50  ;;  %v2936_v53 = vpop.f32.mrb[66].mxu0 }
 0x1da   : > { %v1147_v55 = vadd.f32 %v2936_v53, %v3370_v43  ;;  %v1138_v58 = vpop.f32.mrb[67].mxu0  ;;  %v1392_v62 = vmax.f32 %v1144_v49, 0.0  ;;  %v3429_v49 = vadd.s32 %v3375_v47, %v1848_v30  ;;  %v1855_v53 = vadd.s32 120, %v3364_v42 }
 0x1db   : > { %v1139_v60 = vadd.f32 %v3370_v43, %v1138_v58  ;;  %v1390_v1 = vmax.f32 %v1136_v52, 0.0  ;;  %v3434_v52 = vadd.s32 %v3375_v47, %v1849_v34  ;;  %v1852_v58 = vadd.s32 96, %v3364_v42 }
 0x1dc   : > { %v1393_v63 = vmax.f32 %v1147_v55, 0.0  ;;  %vm1977_vm11 = vcmp.lt.s32.totalorder %v3429_v49, 640 }
 0x1dd   : > { %v1391_v2 = vmax.f32 %v1139_v60, 0.0  ;;  %vm1978_vm12 = vcmp.lt.s32.totalorder %v3434_v52, 640  ;;  %v3458_v3 = vadd.s32 %v3375_v47, %v1852_v58 }
 0x1de   : > { %v1455_v4 = vpack.c.bf16 %v1393_v63, %v1392_v62  ;;  %v1853_v62 = vadd.s32 104, %v3364_v42 }
 0x1df   : > { %v1454_v5 = vpack.c.bf16 %v1391_v2, %v1390_v1  ;;  %v2939_v6 = vpop.f32.mrb[0].mxu1  ;;  %vm1981_vm15 = vcmp.lt.s32.totalorder %v3458_v3, 640 }
 0x1e0   : > { %2683 = vst [vmem:[%s3395_s14 + $0x8] sm:$0xff] %v1455_v4   ;;  %v1776_v9 = vunpack.c.l.bf16 %v1455_v4  ;;  %v1777_v10 = vunpack.c.h.bf16 %v1455_v4  ;;  %v1160_v11 = vadd.f32 %v2939_v6, %v3370_v43  ;;  %v1151_v12 = vpop.f32.mrb[1].mxu1  ;;  %v3453_v6 = vadd.s32 %v3375_v47, %v1855_v53 }
 0x1e1   : > { %2527 = vst [vmem:[%s3395_s14] sm:$0xff] %v1454_v5   ;;  %v1774_v13 = vunpack.c.l.bf16 %v1454_v5  ;;  %v1775_v14 = vunpack.c.h.bf16 %v1454_v5  ;;  %v2940_v15 = vpop.f32.mrb[2].mxu1  ;;  %v1152_v20 = vadd.f32 %v3370_v43, %v1151_v12 }
 0x1e2   : > { %v2035_v18 = vsel %vm1971_vm1, %v1776_v9, -inf  ;;  %v2036_v19 = vsel %vm1972_vm2, %v1777_v10, -inf  ;;  %v1163_v21 = vadd.f32 %v2940_v15, %v3370_v43  ;;  %v1154_v22 = vpop.f32.mrb[3].mxu1  ;;  %v1396_v27 = vmax.f32 %v1160_v11, 0.0 }
 0x1e3   : > { %v2099_v23 = vmax.f32 %v2035_v18, %v2036_v19  ;;  %v2033_v24 = vsel %vm1969_vm3, %v1774_v13, -inf  ;;  %v1155_v29 = vadd.f32 %v3370_v43, %v1154_v22  ;;  %v2034_v35 = vsel %vm1970_vm4, %v1775_v14, -inf }
 0x1e4   : > { %v1397_v28 = vmax.f32 %v1163_v21, 0.0  ;;  %v1394_v36 = vmax.f32 %v1152_v20, 0.0  ;;  %v3462_v13 = vadd.s32 %v3375_v47, %v1853_v62  ;;  %v1858_v18 = vadd.s32 144, %v3364_v42 }
 0x1e5   : > { %v2100_v31 = vmax.f32 %v2033_v24, %v2099_v23  ;;  %v1395_v38 = vmax.f32 %v1155_v29, 0.0  ;;  %vm1984_vm14 = vcmp.lt.s32.totalorder %v3453_v6, 640 }
 0x1e6   : > { %v1457_v37 = vpack.c.bf16 %v1397_v28, %v1396_v27  ;;  %v1856_v27 = vadd.s32 128, %v3364_v42  ;;  %vm1982_vm0 = vcmp.lt.s32.totalorder %v3462_v13, 640 }
 0x1e7   : > { %v2097_v39 = vmax.f32 %v2034_v35, %v2100_v31  ;;  %v2943_v40 = vpop.f32.mrb[4].mxu1  ;;  %v1456_v46 = vpack.c.bf16 %v1395_v38, %v1394_v36  ;;  %v1857_v31 = vadd.s32 136, %v3364_v42 }
 0x1e8   : > { %2685 = vst [vmem:[%s3395_s14 + $0x18] sm:$0xff] %v1457_v37   ;;  %v1780_v44 = vunpack.c.l.bf16 %v1457_v37  ;;  %v1781_v45 = vunpack.c.h.bf16 %v1457_v37  ;;  %v1167_v48 = vpop.f32.mrb[5].mxu1  ;;  %v1176_v50 = vadd.f32 %v2943_v40, %v3370_v43  ;;  %v3479_v37 = vadd.s32 %v3375_v47, %v1858_v18 }
 0x1e9   : > { %v2944_v51 = vpop.f32.mrb[6].mxu1  ;;  %2684 = vst [vmem:[%s3395_s14 + $0x10] sm:$0xff] %v1456_v46   ;;  %v1778_v55 = vunpack.c.l.bf16 %v1456_v46  ;;  %v1168_v56 = vadd.f32 %v3370_v43, %v1167_v48  ;;  %v1779_v0 = vunpack.c.h.bf16 %v1456_v46  ;;  %v3491_v33 = vadd.s32 %v3375_v47, %v1856_v27 }
 0x1ea   : > { %v2039_v54 = vsel %vm1975_vm5, %v1780_v44, -inf  ;;  %v1170_v57 = vpop.f32.mrb[7].mxu1  ;;  %v1179_v60 = vadd.f32 %v2944_v51, %v3370_v43  ;;  %v2040_v63 = vsel %vm1976_vm6, %v1781_v45, -inf  ;;  %v1400_v4 = vmax.f32 %v1176_v50, 0.0 }
 0x1eb   : > { %v2098_v59 = vmax.f32 %v2039_v54, %v2097_v39  ;;  %v1171_v1 = vadd.f32 %v3370_v43, %v1170_v57  ;;  %v2037_v7 = vsel %vm1973_vm7, %v1778_v55, -inf  ;;  %v1398_v8 = vmax.f32 %v1168_v56, 0.0 }
 0x1ec   : > { %v1401_v5 = vmax.f32 %v1179_v60, 0.0  ;;  %v2038_v14 = vsel %vm1974_vm8, %v1779_v0, -inf  ;;  %v3485_v45 = vadd.s32 %v3375_v47, %v1859_v26  ;;  %v3495_v55 = vadd.s32 %v3375_v47, %v1857_v31 }
 0x1ed   : > { %v2103_v2 = vmax.f32 %v2040_v63, %v2098_v59  ;;  %v1399_v9 = vmax.f32 %v1171_v1, 0.0  ;;  %v1862_v56 = vadd.s32 176, %v3364_v42  ;;  %vm1987_vm1 = vcmp.lt.s32.totalorder %v3479_v37, 640 }
 0x1ee   : > { %v1459_v11 = vpack.c.bf16 %v1401_v5, %v1400_v4  ;;  %vm1988_vm2 = vcmp.lt.s32.totalorder %v3485_v45, 640  ;;  %v1863_v1 = vadd.s32 184, %v3364_v42  ;;  %v1860_v4 = vadd.s32 160, %v3364_v42 }
 0x1ef   : > { %v2104_v10 = vmax.f32 %v2037_v7, %v2103_v2  ;;  %v2947_v12 = vpop.f32.mrb[8].mxu1  ;;  %v1458_v15 = vpack.c.bf16 %v1399_v9, %v1398_v8  ;;  %v1861_v5 = vadd.s32 168, %v3364_v42  ;;  %vm1985_vm3 = vcmp.lt.s32.totalorder %v3491_v33, 640 }
 0x1f0   : > { %v1192_v16 = vadd.f32 %v2947_v12, %v3370_v43  ;;  %v1183_v17 = vpop.f32.mrb[9].mxu1  ;;  %2687 = vst [vmem:[%s3395_s14 + $0x28] sm:$0xff] %v1459_v11   ;;  %v1784_v20 = vunpack.c.l.bf16 %v1459_v11  ;;  %v1785_v21 = vunpack.c.h.bf16 %v1459_v11  ;;  %v3514_v61 = vadd.s32 %v3375_v47, %v1862_v56 }
 0x1f1   : > { %v2101_v19 = vmax.f32 %v2038_v14, %v2104_v10  ;;  %v1184_v22 = vadd.f32 %v3370_v43, %v1183_v17  ;;  %v2948_v23 = vpop.f32.mrb[10].mxu1  ;;  %2686 = vst [vmem:[%s3395_s14 + $0x20] sm:$0xff] %v1458_v15   ;;  %v1782_v29 = vunpack.c.l.bf16 %v1458_v15  ;;  %v1783_v39 = vunpack.c.h.bf16 %v1458_v15 }
 0x1f2   : > { %v1195_v24 = vadd.f32 %v2948_v23, %v3370_v43  ;;  %v1186_v25 = vpop.f32.mrb[11].mxu1  ;;  %v2043_v28 = vsel %vm1979_vm9, %v1784_v20, -inf  ;;  %v1404_v35 = vmax.f32 %v1192_v16, 0.0  ;;  %v2044_v38 = vsel %vm1980_vm10, %v1785_v21, -inf }
 0x1f3   : > { %v1187_v30 = vadd.f32 %v3370_v43, %v1186_v25  ;;  %v2102_v34 = vmax.f32 %v2043_v28, %v2101_v19  ;;  %v1402_v40 = vmax.f32 %v1184_v22, 0.0  ;;  %v2041_v46 = vsel %vm1977_vm11, %v1782_v29, -inf }
 0x1f4   : > { %v1405_v36 = vmax.f32 %v1195_v24, 0.0  ;;  %v2042_v49 = vsel %vm1978_vm12, %v1783_v39, -inf  ;;  %vm1986_vm4 = vcmp.lt.s32.totalorder %v3495_v55, 640  ;;  %v3520_v17 = vadd.s32 %v3375_v47, %v1863_v1 }
 0x1f5   : > { %v1403_v41 = vmax.f32 %v1187_v30, 0.0  ;;  %v2107_v32 = vmax.f32 %v2044_v38, %v2102_v34  ;;  %v3525_v6 = vadd.s32 %v3375_v47, %v1860_v4  ;;  %v3528_v21 = vadd.s32 %v3375_v47, %v1861_v5 }
 0x1f6   : > { %v1461_v44 = vpack.c.bf16 %v1405_v36, %v1404_v35  ;;  %vm1991_vm5 = vcmp.lt.s32.totalorder %v3514_v61, 640  ;;  %v1866_v25 = vadd.s32 208, %v3364_v42  ;;  %vm1992_vm6 = vcmp.lt.s32.totalorder %v3520_v17, 640 }
 0x1f7   : > { %v1460_v48 = vpack.c.bf16 %v1403_v41, %v1402_v40  ;;  %v2951_v50 = vpop.f32.mrb[12].mxu1  ;;  %v2108_v51 = vmax.f32 %v2041_v46, %v2107_v32  ;;  %v1867_v35 = vadd.s32 216, %v3364_v42  ;;  %v1864_v36 = vadd.s32 192, %v3364_v42 }
 0x1f8   : > { %2689 = vst [vmem:[%s3395_s14 + $0x38] sm:$0xff] %v1461_v44   ;;  %v1788_v53 = vunpack.c.l.bf16 %v1461_v44  ;;  %v1199_v54 = vpop.f32.mrb[13].mxu1  ;;  %v1789_v57 = vunpack.c.h.bf16 %v1461_v44  ;;  %v1208_v58 = vadd.f32 %v2951_v50, %v3370_v43  ;;  %v1865_v40 = vadd.s32 200, %v3364_v42 }
 0x1f9   : > { %2688 = vst [vmem:[%s3395_s14 + $0x30] sm:$0xff] %v1460_v48   ;;  %v2952_v59 = vpop.f32.mrb[14].mxu1  ;;  %v2105_v60 = vmax.f32 %v2042_v49, %v2108_v51  ;;  %v1200_v63 = vadd.f32 %v3370_v43, %v1199_v54  ;;  %v1786_v52 = vunpack.c.l.bf16 %v1460_v48  ;;  %v1787_v10 = vunpack.c.h.bf16 %v1460_v48 }
 0x1fa   : > { %v2047_v62 = vsel %vm1983_vm13, %v1788_v53, -inf  ;;  %v1202_v0 = vpop.f32.mrb[15].mxu1  ;;  %v1211_v2 = vadd.f32 %v2952_v59, %v3370_v43  ;;  %v2048_v9 = vsel %vm1984_vm14, %v1789_v57, -inf  ;;  %v1408_v11 = vmax.f32 %v1208_v58, 0.0 }
 0x1fb   : > { %v2106_v7 = vmax.f32 %v2047_v62, %v2105_v60  ;;  %v1203_v8 = vadd.f32 %v3370_v43, %v1202_v0  ;;  %v1406_v15 = vmax.f32 %v1200_v63, 0.0  ;;  %v2045_v18 = vsel %vm1981_vm15, %v1786_v52, -inf }
 0x1fc   : > { %v1409_v12 = vmax.f32 %v1211_v2, 0.0  ;;  %v2046_v3 = vsel %vm1982_vm0, %v1787_v10, -inf  ;;  %vm1989_vm7 = vcmp.lt.s32.totalorder %v3525_v6, 640  ;;  %v3548_v44 = vadd.s32 %v3375_v47, %v1866_v25 }
 0x1fd   : > { %v2111_v14 = vmax.f32 %v2048_v9, %v2106_v7  ;;  %v1407_v16 = vmax.f32 %v1203_v8, 0.0  ;;  %vm1990_vm8 = vcmp.lt.s32.totalorder %v3528_v21, 640  ;;  %v3554_v56 = vadd.s32 %v3375_v47, %v1867_v35 }
 0x1fe   : > { %v1463_v19 = vpack.c.bf16 %v1409_v12, %v1408_v11  ;;  %v3559_v45 = vadd.s32 %v3375_v47, %v1864_v36  ;;  %v3562_v59 = vadd.s32 %v3375_v47, %v1865_v40  ;;  %vm1995_vm9 = vcmp.lt.s32.totalorder %v3548_v44, 640 }
 0x1ff   : > { %v2955_v20 = vpop.f32.mrb[16].mxu1  ;;  %v2112_v22 = vmax.f32 %v2045_v18, %v2111_v14  ;;  %v1462_v23 = vpack.c.bf16 %v1407_v16, %v1406_v15  ;;  %v1870_v0 = vadd.s32 240, %v3364_v42  ;;  %vm1996_vm10 = vcmp.lt.s32.totalorder %v3554_v56, 640 }
 0x200   : > { %v1215_v24 = vpop.f32.mrb[17].mxu1  ;;  %2691 = vst [vmem:[%s3395_s14 + $0x48] sm:$0xff] %v1463_v19   ;;  %v1792_v26 = vunpack.c.l.bf16 %v1463_v19  ;;  %v1793_v27 = vunpack.c.h.bf16 %v1463_v19  ;;  %v1224_v28 = vadd.f32 %v2955_v20, %v3370_v43  ;;  %v1871_v9 = vadd.s32 248, %v3364_v42 }
 0x201   : > { %v2956_v29 = vpop.f32.mrb[18].mxu1  ;;  %v2109_v30 = vmax.f32 %v2046_v3, %v2112_v22  ;;  %2690 = vst [vmem:[%s3395_s14 + $0x40] sm:$0xff] %v1462_v23   ;;  %v1216_v31 = vadd.f32 %v3370_v43, %v1215_v24  ;;  %v1790_v38 = vunpack.c.l.bf16 %v1462_v23  ;;  %v1791_v48 = vunpack.c.h.bf16 %v1462_v23 }
 0x202   : > { %v1218_v34 = vpop.f32.mrb[19].mxu1  ;;  %v2051_v13 = vsel %vm1987_vm1, %v1792_v26, -inf  ;;  %v1227_v39 = vadd.f32 %v2956_v29, %v3370_v43  ;;  %v2052_v46 = vsel %vm1988_vm2, %v1793_v27, -inf  ;;  %v1412_v50 = vmax.f32 %v1224_v28, 0.0 }
 0x203   : > { %v2110_v41 = vmax.f32 %v2051_v13, %v2109_v30  ;;  %v1219_v32 = vadd.f32 %v3370_v43, %v1218_v34  ;;  %v1410_v53 = vmax.f32 %v1216_v31, 0.0  ;;  %v2049_v49 = vsel %vm1985_vm3, %v1790_v38, -inf }
 0x204   : > { %v1413_v37 = vmax.f32 %v1227_v39, 0.0  ;;  %v2050_v33 = vsel %vm1986_vm4, %v1791_v48, -inf  ;;  %v1868_v10 = vadd.s32 224, %v3364_v42  ;;  %v1869_v14 = vadd.s32 232, %v3364_v42 }
 0x205   : > { %v2115_v51 = vmax.f32 %v2052_v46, %v2110_v41  ;;  %v1411_v54 = vmax.f32 %v1219_v32, 0.0  ;;  %vm1993_vm11 = vcmp.lt.s32.totalorder %v3559_v45, 640  ;;  %v3582_v18 = vadd.s32 %v3375_v47, %v1870_v0 }
 0x206   : > { %v1465_v57 = vpack.c.bf16 %v1413_v37, %v1412_v50  ;;  %vm1994_vm12 = vcmp.lt.s32.totalorder %v3562_v59, 640  ;;  %v3588_v3 = vadd.s32 %v3375_v47, %v1871_v9  ;;  %v3593_v17 = vadd.s32 %v3375_v47, %v1868_v10 }
 0x207   : > { %v2959_v58 = vpop.f32.mrb[20].mxu1  ;;  %v2116_v60 = vmax.f32 %v2049_v49, %v2115_v51  ;;  %v1464_v62 = vpack.c.bf16 %v1411_v54, %v1410_v53  ;;  %v3596_v29 = vadd.s32 %v3375_v47, %v1869_v14  ;;  %vm1999_vm13 = vcmp.lt.s32.totalorder %v3582_v18, 640 }
 0x208   : > { %v1231_v63 = vpop.f32.mrb[21].mxu1  ;;  %2693 = vst [vmem:[%s3395_s14 + $0x58] sm:$0xff] %v1465_v57   ;;  %v1796_v1 = vunpack.c.l.bf16 %v1465_v57  ;;  %v1797_v52 = vunpack.c.h.bf16 %v1465_v57  ;;  %v1240_v2 = vadd.f32 %v2959_v58, %v3370_v43  ;;  %v1874_v35 = vadd.s32 272, %v3364_v42 }
 0x209   : > { %v2960_v4 = vpop.f32.mrb[22].mxu1  ;;  %v2131_v5 = vmax.f32 %v2050_v33, %v2116_v60  ;;  %2692 = vst [vmem:[%s3395_s14 + $0x50] sm:$0xff] %v1464_v62   ;;  %v1232_v7 = vadd.f32 %v3370_v43, %v1231_v63  ;;  %v1794_v11 = vunpack.c.l.bf16 %v1464_v62  ;;  %v1795_v20 = vunpack.c.h.bf16 %v1464_v62 }
 0x20a   : > { %v1234_v8 = vpop.f32.mrb[23].mxu1  ;;  %v2055_v55 = vsel %vm1991_vm5, %v1796_v1, -inf  ;;  %v1243_v12 = vadd.f32 %v2960_v4, %v3370_v43  ;;  %v2056_v19 = vsel %vm1992_vm6, %v1797_v52, -inf  ;;  %v1416_v22 = vmax.f32 %v1240_v2, 0.0 }
 0x20b   : > { %v2132_v15 = vmax.f32 %v2055_v55, %v2131_v5  ;;  %v1235_v16 = vadd.f32 %v3370_v43, %v1234_v8  ;;  %v1414_v24 = vmax.f32 %v1232_v7, 0.0  ;;  %v2053_v26 = vsel %vm1989_vm7, %v1794_v11, -inf }
 0x20c   : > { %v1417_v61 = vmax.f32 %v1243_v12, 0.0  ;;  %v2054_v6 = vsel %vm1990_vm8, %v1795_v20, -inf  ;;  %vm2000_vm14 = vcmp.lt.s32.totalorder %v3588_v3, 640  ;;  %v1875_v46 = vadd.s32 280, %v3364_v42 }
 0x20d   : > { %v2113_v23 = vmax.f32 %v2056_v19, %v2132_v15  ;;  %v1415_v25 = vmax.f32 %v1235_v16, 0.0  ;;  %v1872_v48 = vadd.s32 256, %v3364_v42  ;;  %v1873_v51 = vadd.s32 264, %v3364_v42 }
 0x20e   : > { %v1467_v27 = vpack.c.bf16 %v1417_v61, %v1416_v22  ;;  %vm1997_vm15 = vcmp.lt.s32.totalorder %v3593_v17, 640  ;;  %v3616_v49 = vadd.s32 %v3375_v47, %v1874_v35  ;;  %vm1998_vm0 = vcmp.lt.s32.totalorder %v3596_v29, 640 }
 0x20f   : > { %v2963_v28 = vpop.f32.mrb[24].mxu1  ;;  %v2114_v30 = vmax.f32 %v2053_v26, %v2113_v23  ;;  %v1466_v31 = vpack.c.bf16 %v1415_v25, %v1414_v24  ;;  %v3622_v33 = vadd.s32 %v3375_v47, %v1875_v46  ;;  %v3627_v56 = vadd.s32 %v3375_v47, %v1872_v48 }
 0x210   : > { %v1247_v34 = vpop.f32.mrb[25].mxu1  ;;  %2695 = vst [vmem:[%s3395_s14 + $0x68] sm:$0xff] %v1467_v27   ;;  %v1800_v36 = vunpack.c.l.bf16 %v1467_v27  ;;  %v1801_v13 = vunpack.c.h.bf16 %v1467_v27  ;;  %v1256_v38 = vadd.f32 %v2963_v28, %v3370_v43  ;;  %v3630_v4 = vadd.s32 %v3375_v47, %v1873_v51 }
 0x211   : > { %v2964_v39 = vpop.f32.mrb[26].mxu1  ;;  %v2129_v40 = vmax.f32 %v2054_v6, %v2114_v30  ;;  %2694 = vst [vmem:[%s3395_s14 + $0x60] sm:$0xff] %v1466_v31   ;;  %v1248_v41 = vadd.f32 %v3370_v43, %v1247_v34  ;;  %v1798_v50 = vunpack.c.l.bf16 %v1466_v31  ;;  %v1799_v58 = vunpack.c.h.bf16 %v1466_v31 }
 0x212   : > { %v1250_v32 = vpop.f32.mrb[27].mxu1  ;;  %v2059_v21 = vsel %vm1995_vm9, %v1800_v36, -inf  ;;  %v1259_v37 = vadd.f32 %v2964_v39, %v3370_v43  ;;  %v2060_v57 = vsel %vm1996_vm10, %v1801_v13, -inf  ;;  %v1420_v60 = vmax.f32 %v1256_v38, 0.0 }
 0x213   : > { %v2130_v53 = vmax.f32 %v2059_v21, %v2129_v40  ;;  %v1251_v54 = vadd.f32 %v3370_v43, %v1250_v32  ;;  %v1418_v63 = vmax.f32 %v1248_v41, 0.0  ;;  %v2057_v1 = vsel %vm1993_vm11, %v1798_v50, -inf }
 0x214   : > { %v1421_v44 = vmax.f32 %v1259_v37, 0.0  ;;  %vm2003_vm1 = vcmp.lt.s32.totalorder %v3616_v49, 640  ;;  %v1878_v9 = vadd.s32 304, %v3364_v42  ;;  %v2058_v45 = vsel %vm1994_vm12, %v1799_v58, -inf }
 0x215   : > { %v2119_v62 = vmax.f32 %v2060_v57, %v2130_v53  ;;  %v1419_v0 = vmax.f32 %v1251_v54, 0.0  ;;  %vm2004_vm2 = vcmp.lt.s32.totalorder %v3622_v33, 640  ;;  %v1879_v19 = vadd.s32 312, %v3364_v42 }
 0x216   : > { %v1469_v52 = vpack.c.bf16 %v1421_v44, %v1420_v60  ;;  %v1876_v20 = vadd.s32 288, %v3364_v42  ;;  %v1877_v23 = vadd.s32 296, %v3364_v42  ;;  %vm2001_vm3 = vcmp.lt.s32.totalorder %v3627_v56, 640 }
 0x217   : > { %v2967_v2 = vpop.f32.mrb[28].mxu1  ;;  %v2120_v5 = vmax.f32 %v2057_v1, %v2119_v62  ;;  %v1468_v7 = vpack.c.bf16 %v1419_v0, %v1418_v63  ;;  %v3650_v26 = vadd.s32 %v3375_v47, %v1878_v9  ;;  %vm2002_vm4 = vcmp.lt.s32.totalorder %v3630_v4, 640 }
 0x218   : > { %v1263_v8 = vpop.f32.mrb[29].mxu1  ;;  %2697 = vst [vmem:[%s3395_s14 + $0x78] sm:$0xff] %v1469_v52   ;;  %v1804_v10 = vunpack.c.l.bf16 %v1469_v52  ;;  %v1805_v55 = vunpack.c.h.bf16 %v1469_v52  ;;  %v1272_v11 = vadd.f32 %v2967_v2, %v3370_v43  ;;  %v3656_v6 = vadd.s32 %v3375_v47, %v1879_v19 }
 0x219   : > { %v2968_v12 = vpop.f32.mrb[30].mxu1  ;;  %v2135_v14 = vmax.f32 %v2058_v45, %v2120_v5  ;;  %2696 = vst [vmem:[%s3395_s14 + $0x70] sm:$0xff] %v1468_v7   ;;  %v1264_v15 = vadd.f32 %v3370_v43, %v1263_v8  ;;  %v1802_v22 = vunpack.c.l.bf16 %v1468_v7  ;;  %v1803_v28 = vunpack.c.h.bf16 %v1468_v7 }
 0x21a   : > { %v1266_v16 = vpop.f32.mrb[31].mxu1  ;;  %v2063_v59 = vsel %vm1999_vm13, %v1804_v10, -inf  ;;  %v1275_v61 = vadd.f32 %v2968_v12, %v3370_v43  ;;  %v2064_v27 = vsel %vm2000_vm14, %v1805_v55, -inf  ;;  %v1424_v30 = vmax.f32 %v1272_v11, 0.0 }
 0x21b   : > { %v2136_v24 = vmax.f32 %v2063_v59, %v2135_v14  ;;  %v1267_v25 = vadd.f32 %v3370_v43, %v1266_v16  ;;  %v1422_v34 = vmax.f32 %v1264_v15, 0.0  ;;  %v2061_v36 = vsel %vm1997_vm15, %v1802_v22, -inf }
 0x21c   : > { %v1425_v18 = vmax.f32 %v1275_v61, 0.0  ;;  %v3661_v3 = vadd.s32 %v3375_v47, %v1876_v20  ;;  %v3664_v39 = vadd.s32 %v3375_v47, %v1877_v23  ;;  %vm2007_vm5 = vcmp.lt.s32.totalorder %v3650_v26, 640 }
 0x21d   : > { %v2117_v31 = vmax.f32 %v2064_v27, %v2136_v24  ;;  %v1423_v35 = vmax.f32 %v1267_v25, 0.0  ;;  %v1882_v46 = vadd.s32 336, %v3364_v42  ;;  %v2062_v17 = vsel %vm1998_vm0, %v1803_v28, -inf }
 0x21e   : > { %v1471_v13 = vpack.c.bf16 %v1425_v18, %v1424_v30  ;;  %vm2008_vm6 = vcmp.lt.s32.totalorder %v3656_v6, 640  ;;  %v1883_v57 = vadd.s32 344, %v3364_v42  ;;  %v1880_v58 = vadd.s32 320, %v3364_v42 }
 0x21f   : > { %v2971_v38 = vpop.f32.mrb[32].mxu1  ;;  %v2118_v40 = vmax.f32 %v2061_v36, %v2117_v31  ;;  %v1470_v41 = vpack.c.bf16 %v1423_v35, %v1422_v34  ;;  %v1881_v62 = vadd.s32 328, %v3364_v42  ;;  %vm2005_vm7 = vcmp.lt.s32.totalorder %v3661_v3, 640 }
 0x220   : > { %v1279_v32 = vpop.f32.mrb[33].mxu1  ;;  %2699 = vst [vmem:[%s3395_s14 + $0x88] sm:$0xff] %v1471_v13   ;;  %v1808_v48 = vunpack.c.l.bf16 %v1471_v13  ;;  %v1809_v21 = vunpack.c.h.bf16 %v1471_v13  ;;  %v1288_v50 = vadd.f32 %v2971_v38, %v3370_v43  ;;  %v3684_v1 = vadd.s32 %v3375_v47, %v1882_v46 }
 0x221   : > { %v2972_v37 = vpop.f32.mrb[34].mxu1  ;;  %v2133_v51 = vmax.f32 %v2062_v17, %v2118_v40  ;;  %2698 = vst [vmem:[%s3395_s14 + $0x80] sm:$0xff] %v1470_v41   ;;  %v1280_v53 = vadd.f32 %v3370_v43, %v1279_v32  ;;  %v1806_v60 = vunpack.c.l.bf16 %v1470_v41  ;;  %v1807_v2 = vunpack.c.h.bf16 %v1470_v41 }
 0x222   : > { %v1282_v54 = vpop.f32.mrb[35].mxu1  ;;  %v2067_v29 = vsel %vm2003_vm1, %v1808_v48, -inf  ;;  %v1291_v44 = vadd.f32 %v2972_v37, %v3370_v43  ;;  %v2068_v52 = vsel %vm2004_vm2, %v1809_v21, -inf  ;;  %v1428_v5 = vmax.f32 %v1288_v50, 0.0 }
 0x223   : > { %v2134_v63 = vmax.f32 %v2067_v29, %v2133_v51  ;;  %v1283_v0 = vadd.f32 %v3370_v43, %v1282_v54  ;;  %v1426_v8 = vmax.f32 %v1280_v53, 0.0  ;;  %vm2006_vm8 = vcmp.lt.s32.totalorder %v3664_v39, 640 }
 0x224   : > { %v1429_v49 = vmax.f32 %v1291_v44, 0.0  ;;  %v3690_v45 = vadd.s32 %v3375_v47, %v1883_v57  ;;  %v2065_v10 = vsel %vm2001_vm3, %v1806_v60, -inf  ;;  %v3695_v33 = vadd.s32 %v3375_v47, %v1880_v58 }
 0x225   : > { %v2123_v7 = vmax.f32 %v2068_v52, %v2134_v63  ;;  %v1427_v9 = vmax.f32 %v1283_v0, 0.0  ;;  %v3698_v12 = vadd.s32 %v3375_v47, %v1881_v62  ;;  %vm2011_vm9 = vcmp.lt.s32.totalorder %v3684_v1, 640 }
 0x226   : > { %v1473_v55 = vpack.c.bf16 %v1429_v49, %v1428_v5  ;;  %v1886_v19 = vadd.s32 368, %v3364_v42  ;;  %v2066_v56 = vsel %vm2002_vm4, %v1807_v2, -inf  ;;  %vm2012_vm10 = vcmp.lt.s32.totalorder %v3690_v45, 640 }
 0x227   : > { %v2975_v11 = vpop.f32.mrb[36].mxu1  ;;  %v2124_v14 = vmax.f32 %v2065_v10, %v2123_v7  ;;  %v1472_v15 = vpack.c.bf16 %v1427_v9, %v1426_v8  ;;  %v1887_v27 = vadd.s32 376, %v3364_v42  ;;  %v1884_v18 = vadd.s32 352, %v3364_v42 }
 0x228   : > { %v1295_v16 = vpop.f32.mrb[37].mxu1  ;;  %2701 = vst [vmem:[%s3395_s14 + $0x98] sm:$0xff] %v1473_v55   ;;  %v1812_v20 = vunpack.c.l.bf16 %v1473_v55  ;;  %v1813_v59 = vunpack.c.h.bf16 %v1473_v55  ;;  %v1304_v22 = vadd.f32 %v2975_v11, %v3370_v43  ;;  %v3716_v35 = vadd.s32 %v3375_v47, %v1886_v19 }
 0x229   : > { %v2976_v61 = vpop.f32.mrb[38].mxu1  ;;  %v2139_v23 = vmax.f32 %v2066_v56, %v2124_v14  ;;  %2700 = vst [vmem:[%s3395_s14 + $0x90] sm:$0xff] %v1472_v15   ;;  %v1296_v24 = vadd.f32 %v3370_v43, %v1295_v16  ;;  %v1810_v4 = vunpack.c.l.bf16 %v1472_v15  ;;  %v1885_v36 = vadd.s32 360, %v3364_v42 }
 0x22a   : > { %v1298_v25 = vpop.f32.mrb[39].mxu1  ;;  %v2071_v28 = vsel %vm2007_vm5, %v1812_v20, -inf  ;;  %v1307_v30 = vadd.f32 %v2976_v61, %v3370_v43  ;;  %v2072_v13 = vsel %vm2008_vm6, %v1813_v59, -inf  ;;  %v1811_v38 = vunpack.c.h.bf16 %v1472_v15 }
 0x22b   : > { %v2140_v31 = vmax.f32 %v2071_v28, %v2139_v23  ;;  %v1299_v34 = vadd.f32 %v3370_v43, %v1298_v25  ;;  %v1432_v40 = vmax.f32 %v1304_v22, 0.0  ;;  %v1430_v32 = vmax.f32 %v1296_v24, 0.0 }
 0x22c   : > { %v1433_v26 = vmax.f32 %v1307_v30, 0.0  ;;  %v3722_v17 = vadd.s32 %v3375_v47, %v1887_v27  ;;  %v2069_v48 = vsel %vm2005_vm7, %v1810_v4, -inf  ;;  %vm2009_vm11 = vcmp.lt.s32.totalorder %v3695_v33, 640 }
 0x22d   : > { %v2147_v41 = vmax.f32 %v2072_v13, %v2140_v31  ;;  %v1431_v46 = vmax.f32 %v1299_v34, 0.0  ;;  %vm2010_vm12 = vcmp.lt.s32.totalorder %v3698_v12, 640  ;;  %v3729_v53 = vadd.s32 %v3375_v47, %v1884_v18 }
 0x22e   : > { %v1475_v21 = vpack.c.bf16 %v1433_v26, %v1432_v40  ;;  %v3732_v54 = vadd.s32 %v3375_v47, %v1885_v36  ;;  %v2070_v3 = vsel %vm2006_vm8, %v1811_v38, -inf  ;;  %vm2015_vm13 = vcmp.lt.s32.totalorder %v3716_v35, 640 }
 0x22f   : > { %v2979_v6 = vpop.f32.mrb[40].mxu1  ;;  %v2148_v50 = vmax.f32 %v2069_v48, %v2147_v41  ;;  %v1474_v37 = vpack.c.bf16 %v1431_v46, %v1430_v32  ;;  %vm2016_vm14 = vcmp.lt.s32.totalorder %v3722_v17, 640  ;;  %v1890_v2 = vadd.s32 400, %v3364_v42 }
 0x230   : > { %v1311_v51 = vpop.f32.mrb[41].mxu1  ;;  %2703 = vst [vmem:[%s3395_s14 + $0xa8] sm:$0xff] %v1475_v21   ;;  %v1816_v57 = vunpack.c.l.bf16 %v1475_v21  ;;  %v1817_v58 = vunpack.c.h.bf16 %v1475_v21  ;;  %v1320_v29 = vadd.f32 %v2979_v6, %v3370_v43  ;;  %v1891_v7 = vadd.s32 408, %v3364_v42 }
 0x231   : > { %v2980_v60 = vpop.f32.mrb[42].mxu1  ;;  %v2121_v44 = vmax.f32 %v2070_v3, %v2148_v50  ;;  %2702 = vst [vmem:[%s3395_s14 + $0xa0] sm:$0xff] %v1474_v37   ;;  %v1312_v62 = vadd.f32 %v3370_v43, %v1311_v51  ;;  %v1814_v39 = vunpack.c.l.bf16 %v1474_v37  ;;  %v1888_v8 = vadd.s32 384, %v3364_v42 }
 0x232   : > { %v1314_v63 = vpop.f32.mrb[43].mxu1  ;;  %v2075_v0 = vsel %vm2011_vm9, %v1816_v57, -inf  ;;  %v1323_v52 = vadd.f32 %v2980_v60, %v3370_v43  ;;  %v2076_v9 = vsel %vm2012_vm10, %v1817_v58, -inf  ;;  %v1815_v10 = vunpack.c.h.bf16 %v1474_v37 }
 0x233   : > { %v2122_v5 = vmax.f32 %v2075_v0, %v2121_v44  ;;  %v1315_v49 = vadd.f32 %v3370_v43, %v1314_v63  ;;  %v1436_v55 = vmax.f32 %v1320_v29, 0.0  ;;  %v1434_v14 = vmax.f32 %v1312_v62, 0.0  ;;  %v3787_v63 = vld [vmem:[%s3868_s4] ss:$0 sm:$0xff] }
 0x234   : > { %v1437_v11 = vmax.f32 %v1323_v52, 0.0  ;;  %v1889_v16 = vadd.s32 392, %v3364_v42  ;;  %v2073_v19 = vsel %vm2009_vm11, %v1814_v39, -inf  ;;  %vm2013_vm15 = vcmp.lt.s32.totalorder %v3729_v53, 640 }
 0x235   : > { %v2137_v1 = vmax.f32 %v2076_v9, %v2122_v5  ;;  %v1435_v15 = vmax.f32 %v1315_v49, 0.0  ;;  %v1955_v45 = vadd.s32 %v3375_v47, %v1890_v2  ;;  %vm2014_vm0 = vcmp.lt.s32.totalorder %v3732_v54, 640 }
 0x236   : > { %v1477_v56 = vpack.c.bf16 %v1437_v11, %v1436_v55  ;;  %v1956_v23 = vadd.s32 %v3375_v47, %v1891_v7  ;;  %v2074_v24 = vsel %vm2010_vm12, %v1815_v10, -inf  ;;  %v1953_v31 = vadd.s32 %v3375_v47, %v1888_v8 }
 0x237   : > { %v2983_v20 = vpop.f32.mrb[44].mxu1  ;;  %v2138_v59 = vmax.f32 %v2073_v19, %v2137_v1  ;;  %v1476_v22 = vpack.c.bf16 %v1435_v15, %v1434_v14  ;;  %v3766_v34 = vadd.s32 %v3375_v47, %v1889_v16  ;;  %vm2019_vm1 = vcmp.lt.s32.totalorder %v1955_v45, 640 }
 0x238   : > { %v1327_v61 = vpop.f32.mrb[45].mxu1  ;;  %2705 = vst [vmem:[%s3395_s14 + $0xb8] sm:$0xff] %v1477_v56   ;;  %v1820_v33 = vunpack.c.l.bf16 %v1477_v56  ;;  %v1821_v25 = vunpack.c.h.bf16 %v1477_v56  ;;  %v1336_v27 = vadd.f32 %v2983_v20, %v3370_v43  ;;  %vm2020_vm2 = vcmp.lt.s32.totalorder %v1956_v23, 640 }
 0x239   : > { %v2984_v28 = vpop.f32.mrb[46].mxu1  ;;  %v2145_v4 = vmax.f32 %v2074_v24, %v2138_v59  ;;  %2704 = vst [vmem:[%s3395_s14 + $0xb0] sm:$0xff] %v1476_v22   ;;  %v1328_v30 = vadd.f32 %v3370_v43, %v1327_v61  ;;  %v1818_v36 = vunpack.c.l.bf16 %v1476_v22  ;;  %v1894_v26 = vadd.s32 432, %v3364_v42 }
 0x23a   : > { %v1330_v18 = vpop.f32.mrb[47].mxu1  ;;  %v2079_v12 = vsel %vm2015_vm13, %v1820_v33, -inf  ;;  %v1339_v13 = vadd.f32 %v2984_v28, %v3370_v43  ;;  %v2080_v41 = vsel %vm2016_vm14, %v1821_v25, -inf  ;;  %v1819_v32 = vunpack.c.h.bf16 %v1476_v22 }
 0x23b   : > { %v2146_v38 = vmax.f32 %v2079_v12, %v2145_v4  ;;  %v1331_v40 = vadd.f32 %v3370_v43, %v1330_v18  ;;  %v1440_v46 = vmax.f32 %v1336_v27, 0.0  ;;  %v1438_v35 = vmax.f32 %v1328_v30, 0.0 }
 0x23c   : > { %v1441_v48 = vmax.f32 %v1339_v13, 0.0  ;;  %v1895_v50 = vadd.s32 440, %v3364_v42  ;;  %v2077_v37 = vsel %vm2013_vm15, %v1818_v36, -inf  ;;  %vm2017_vm3 = vcmp.lt.s32.totalorder %v1953_v31, 640 }
 0x23d   : > { %v2127_v21 = vmax.f32 %v2080_v41, %v2146_v38  ;;  %v1439_v6 = vmax.f32 %v1331_v40, 0.0  ;;  %v1892_v3 = vadd.s32 416, %v3364_v42  ;;  %v1959_v29 = vadd.s32 %v3375_v47, %v1894_v26 }
 0x23e   : > { %v1479_v51 = vpack.c.bf16 %v1441_v48, %v1440_v46  ;;  %v1893_v60 = vadd.s32 424, %v3364_v42  ;;  %v2078_v44 = vsel %vm2014_vm0, %v1819_v32, -inf  ;;  %vm2018_vm4 = vcmp.lt.s32.totalorder %v3766_v34, 640 }
 0x23f   : > { %v2987_v43 = vpop.f32.mrb[48].mxu1  ;;  %v2128_v17 = vmax.f32 %v2077_v37, %v2127_v21  ;;  %v1478_v57 = vpack.c.bf16 %v1439_v6, %v1438_v35  ;;  %v1960_v54 = vadd.s32 %v3375_v47, %v1895_v50  ;;  %v1957_v9 = vadd.s32 %v3375_v47, %v1892_v3 }
 0x240   : > { %v1343_v58 = vpop.f32.mrb[49].mxu1  ;;  %2707 = vst [vmem:[%s3395_s14 + $0xc8] sm:$0xff] %v1479_v51   ;;  %v1824_v62 = vunpack.c.l.bf16 %v1479_v51  ;;  %v1825_v53 = vunpack.c.h.bf16 %v1479_v51  ;;  %v1352_v0 = vadd.f32 %v3787_v63, %v2987_v43  ;;  %vm2023_vm5 = vcmp.lt.s32.totalorder %v1959_v29, 640 }
 0x241   : > { %v2988_v39 = vpop.f32.mrb[50].mxu1  ;;  %v2143_v52 = vmax.f32 %v2078_v44, %v2128_v17  ;;  %2706 = vst [vmem:[%s3395_s14 + $0xc0] sm:$0xff] %v1478_v57   ;;  %v1344_v2 = vadd.f32 %v3787_v63, %v1343_v58  ;;  %v1822_v7 = vunpack.c.l.bf16 %v1478_v57  ;;  %v1958_v11 = vadd.s32 %v3375_v47, %v1893_v60 }
 0x242   : > { %v1346_v5 = vpop.f32.mrb[51].mxu1  ;;  %v2083_v49 = vsel %vm2019_vm1, %v1824_v62, -inf  ;;  %v1355_v8 = vadd.f32 %v3787_v63, %v2988_v39  ;;  %v2084_v1 = vsel %vm2020_vm2, %v1825_v53, -inf  ;;  %v1823_v14 = vunpack.c.h.bf16 %v1478_v57 }
 0x243   : > { %v2144_v10 = vmax.f32 %v2083_v49, %v2143_v52  ;;  %v1347_v55 = vadd.f32 %v3787_v63, %v1346_v5  ;;  %v1444_v15 = vmax.f32 %v1352_v0, 0.0  ;;  %v1442_v56 = vmax.f32 %v1344_v2, 0.0 }
 0x244   : > { %v1445_v16 = vmax.f32 %v1355_v8, 0.0  ;;  %v1898_v45 = vadd.s32 464, %v3364_v42  ;;  %v2081_v59 = vsel %vm2017_vm3, %v1822_v7, -inf  ;;  %vm2024_vm6 = vcmp.lt.s32.totalorder %v1960_v54, 640 }
 0x245   : > { %v2151_v19 = vmax.f32 %v2084_v1, %v2144_v10  ;;  %v1443_v20 = vmax.f32 %v1347_v55, 0.0  ;;  %v1899_v24 = vadd.s32 472, %v3364_v42  ;;  %vm2021_vm7 = vcmp.lt.s32.totalorder %v1957_v9, 640 }
 0x246   : > { %v1481_v22 = vpack.c.bf16 %v1445_v16, %v1444_v15  ;;  %v1896_v27 = vadd.s32 448, %v3364_v42  ;;  %v2082_v28 = vsel %vm2018_vm4, %v1823_v14, -inf  ;;  %v1963_v13 = vadd.s32 %v3375_v47, %v1898_v45 }
 0x247   : > { %v2991_v61 = vpop.f32.mrb[52].mxu1  ;;  %v2152_v33 = vmax.f32 %v2081_v59, %v2151_v19  ;;  %v1480_v23 = vpack.c.bf16 %v1443_v20, %v1442_v56  ;;  %v1897_v40 = vadd.s32 456, %v3364_v42  ;;  %v1964_v32 = vadd.s32 %v3375_v47, %v1899_v24 }
 0x248   : > { %v1359_v25 = vpop.f32.mrb[53].mxu1  ;;  %2709 = vst [vmem:[%s3395_s14 + $0xd8] sm:$0xff] %v1481_v22   ;;  %v1828_v4 = vunpack.c.l.bf16 %v1481_v22  ;;  %v1829_v30 = vunpack.c.h.bf16 %v1481_v22  ;;  %v1368_v18 = vadd.f32 %v3787_v63, %v2991_v61  ;;  %vm2022_vm8 = vcmp.lt.s32.totalorder %v1958_v11, 640 }
 0x249   : > { %v2992_v31 = vpop.f32.mrb[54].mxu1  ;;  %v2155_v12 = vmax.f32 %v2082_v28, %v2152_v33  ;;  %2708 = vst [vmem:[%s3395_s14 + $0xd0] sm:$0xff] %v1480_v23   ;;  %v1360_v36 = vadd.f32 %v3787_v63, %v1359_v25  ;;  %v1826_v41 = vunpack.c.l.bf16 %v1480_v23  ;;  %v1961_v21 = vadd.s32 %v3375_v47, %v1896_v27 }
 0x24a   : > { %v1362_v38 = vpop.f32.mrb[55].mxu1  ;;  %v2087_v26 = vsel %vm2023_vm5, %v1828_v4, -inf  ;;  %v1371_v34 = vadd.f32 %v3787_v63, %v2992_v31  ;;  %v2088_v35 = vsel %vm2024_vm6, %v1829_v30, -inf  ;;  %v1827_v6 = vunpack.c.h.bf16 %v1480_v23 }
 0x24b   : > { %v2156_v46 = vmax.f32 %v2087_v26, %v2155_v12  ;;  %v1363_v48 = vadd.f32 %v3787_v63, %v1362_v38  ;;  %v1448_v50 = vmax.f32 %v1368_v18, 0.0  ;;  %v1446_v43 = vmax.f32 %v1360_v36, 0.0 }
 0x24c   : > { %v1449_v37 = vmax.f32 %v1371_v34, 0.0  ;;  %v1962_v17 = vadd.s32 %v3375_v47, %v1897_v40  ;;  %v2085_v57 = vsel %vm2021_vm7, %v1826_v41, -inf  ;;  %vm2027_vm9 = vcmp.lt.s32.totalorder %v1963_v13, 640 }
 0x24d   : > { %v2125_v51 = vmax.f32 %v2088_v35, %v2156_v46  ;;  %v1447_v3 = vmax.f32 %v1363_v48, 0.0  ;;  %vm2028_vm10 = vcmp.lt.s32.totalorder %v1964_v32, 640  ;;  %vm2025_vm11 = vcmp.lt.s32.totalorder %v1961_v21, 640 }
 0x24e   : > { %v1483_v58 = vpack.c.bf16 %v1449_v37, %v1448_v50  ;;  %v1902_v53 = vadd.s32 496, %v3364_v42  ;;  %v2086_v0 = vsel %vm2022_vm8, %v1827_v6, -inf  ;;  %vm2026_vm12 = vcmp.lt.s32.totalorder %v1962_v17, 640 }
 0x24f   : > { %v2995_v29 = vpop.f32.mrb[56].mxu1  ;;  %v2126_v60 = vmax.f32 %v2085_v57, %v2125_v51  ;;  %v1482_v44 = vpack.c.bf16 %v1447_v3, %v1446_v43  ;;  %v1903_v7 = vadd.s32 504, %v3364_v42  ;;  %v1900_v11 = vadd.s32 480, %v3364_v42 }
 0x250   : > { %v1375_v62 = vpop.f32.mrb[57].mxu1  ;;  %2711 = vst [vmem:[%s3395_s14 + $0xe8] sm:$0xff] %v1483_v58   ;;  %v1832_v39 = vunpack.c.l.bf16 %v1483_v58  ;;  %v1833_v52 = vunpack.c.h.bf16 %v1483_v58  ;;  %v1384_v2 = vadd.f32 %v3787_v63, %v2995_v29  ;;  %v1967_v14 = vadd.s32 %v3375_v47, %v1902_v53 }
 0x251   : > { %v2996_v54 = vpop.f32.mrb[58].mxu1  ;;  %v2141_v5 = vmax.f32 %v2086_v0, %v2126_v60  ;;  %2710 = vst [vmem:[%s3395_s14 + $0xe0] sm:$0xff] %v1482_v44   ;;  %v1376_v49 = vadd.f32 %v3787_v63, %v1375_v62  ;;  %v1830_v10 = vunpack.c.l.bf16 %v1482_v44  ;;  %v1901_v16 = vadd.s32 488, %v3364_v42 }
 0x252   : > { %v1378_v8 = vpop.f32.mrb[59].mxu1  ;;  %v2091_v9 = vsel %vm2027_vm9, %v1832_v39, -inf  ;;  %v1387_v55 = vadd.f32 %v3787_v63, %v2996_v54  ;;  %v2092_v19 = vsel %vm2028_vm10, %v1833_v52, -inf  ;;  %v1831_v56 = vunpack.c.h.bf16 %v1482_v44 }
 0x253   : > { %v2142_v1 = vmax.f32 %v2091_v9, %v2141_v5  ;;  %v1379_v15 = vadd.f32 %v3787_v63, %v1378_v8  ;;  %v1452_v20 = vmax.f32 %v1384_v2, 0.0  ;;  %v1450_v22 = vmax.f32 %v1376_v49, 0.0 }
 0x254   : > { %v1453_v45 = vmax.f32 %v1387_v55, 0.0  ;;  %v1968_v61 = vadd.s32 %v3375_v47, %v1903_v7  ;;  %v2089_v33 = vsel %vm2025_vm11, %v1830_v10, -inf  ;;  %vm2031_vm13 = vcmp.lt.s32.totalorder %v1967_v14, 640 }
 0x255   : > { %v2149_v59 = vmax.f32 %v2092_v19, %v2142_v1  ;;  %v1451_v24 = vmax.f32 %v1379_v15, 0.0  ;;  %v1965_v42 = vadd.s32 %v3375_v47, %v1900_v11  ;;  %v2090_v27 = vsel %vm2026_vm12, %v1831_v56, -inf }
 0x256   : > { %v1485_v23 = vpack.c.bf16 %v1453_v45, %v1452_v20  ;;  %vm2032_vm14 = vcmp.lt.s32.totalorder %v1968_v61, 640  ;;  %v1966_v18 = vadd.s32 %v3375_v47, %v1901_v16 }
 0x257   : > { %v2150_v25 = vmax.f32 %v2089_v33, %v2149_v59  ;;  %v1484_v63 = vpack.c.bf16 %v1451_v24, %v1450_v22  ;;  %vm2029_vm15 = vcmp.lt.s32.totalorder %v1965_v42, 640 }
 0x258   : > { %2713 = vst [vmem:[%s3395_s14 + $0xf8] sm:$0xff] %v1485_v23   ;;  %v1836_v28 = vunpack.c.l.bf16 %v1485_v23  ;;  %v1837_v4 = vunpack.c.h.bf16 %v1485_v23  ;;  %vm2030_vm0 = vcmp.lt.s32.totalorder %v1966_v18, 640 }
 0x259   : > { %v2153_v30 = vmax.f32 %v2090_v27, %v2150_v25  ;;  %2712 = vst [vmem:[%s3395_s14 + $0xf0] sm:$0xff] %v1484_v63   ;;  %v1834_v12 = vunpack.c.l.bf16 %v1484_v63  ;;  %v1835_v38 = vunpack.c.h.bf16 %v1484_v63 }
 0x25a   : > { %v2095_v31 = vsel %vm2031_vm13, %v1836_v28, -inf  ;;  %v2096_v13 = vsel %vm2032_vm14, %v1837_v4, -inf }
 0x25b   : > { %v2154_v36 = vmax.f32 %v2095_v31, %v2153_v30  ;;  %v2093_v26 = vsel %vm2029_vm15, %v1834_v12, -inf  ;;  %v2094_v34 = vsel %vm2030_vm0, %v1835_v38, -inf  ;;  %2163 = sbr.rel (%p2454_p0) target bundleno = 612 (0x264), region = 40 }
 0x25d   : > { %v2157_v40 = vmax.f32 %v2096_v13, %v2154_v36 }
 0x25f   : > { %v2158_v41 = vmax.f32 %v2093_v26, %v2157_v40 }
 0x261   : > { %v2159_v32 = vmax.f32 %v2094_v34, %v2158_v41 }
 0x263   : > { %2164 = vst [vmem:[#allocation2] sm:$0xff] %v2159_v32 }
 0x264 PF: > { %p2455_p1 = scmp.le.s32.totalorder %s3099_s26, 0 }
 0x266   : > { %2168 = sbr.rel (%p2455_p1) target bundleno = 622 (0x26e), region = 44 }
 0x26a   : > { %v2169_v47 = vld [vmem:[#allocation2] sm:$0xff] (!%p2455_p1) }
 0x26b   : > { %v2170_v46 = vmax.f32 (!%p2455_p1), %v2169_v47, %v2159_v32 }
 0x26d   : > { %2171 = vst [vmem:[#allocation2] sm:$0xff] %v2170_v46 }
 0x26e PF: > { %p2456_p2 = scmp.ne.s32.totalorder %s3099_s26, 1 }
 0x270   : > { %2175 = sbr.rel (%p2456_p2) target bundleno = 642 (0x282), region = 48 }
 0x274   : > { %v2176_v48 = vld [vmem:[#allocation2] sm:$0xff] (!%p2456_p2) }
 0x275   : > { %v2177_v21 = vrot.slane (!%p2456_p2), %v2176_v48, 4 }
 0x277   : > { %v2178_v35 = vmax.f32 %v2176_v48, %v2177_v21 }
 0x279   : > { %v2179_v6 = vrot.slane %v2178_v35, 2 }
 0x27b   : > { %v2180_v50 = vmax.f32 %v2178_v35, %v2179_v6 }
 0x27d   : > { %v2181_v37 = vrot.slane %v2180_v50, 1 }
 0x27f   : > { %v2182_v51 = vmax.f32 %v2180_v50, %v2181_v37 }
 0x281   : > { %2183 = vst [vmem:[%s288_s25] sm:$0x1] %v2182_v51 }
 0x282 PF: > { %s23_s29 = sadd.s32 1, %s3115_s29   ;;  %s3871_s26 = smov %s3107_s28 }
 0x283   : > { %p20_p3 = scmp.ge.s32.totalorder %s23_s29, 10   ;;  %s3872_s27 = smov %s3111_s0 }
 0x284   : > { %s3873_s28 = smov %s3876_s30  ;;  %s3874_s0 = smov %s3880_s7 }
 0x285   :  { %22 = sbr.rel (!%p20_p3) target bundleno = 18 (0x12), region = 90 }

</bundles_post_ra>
